<compile_context>
chip_gen: v7x
topology: tpu7x:2x2x1
jax: 0.10.0
libtpu: 0.0.40
codegen_flags: <defaults>
</compile_context>

<pallas_src>
import math
import numpy as np
import jax
import jax.numpy as jnp
from jax import lax
from jax.experimental import pallas as pl
from jax.experimental.pallas import tpu as pltpu

_NEG_BIG = -1e30


def _masked_softmax_rows(s):
    """Row softmax of an already-masked score matrix (approx EUP reciprocal)."""
    m = jnp.max(s, axis=-1, keepdims=True)
    e = jnp.exp(s - m)
    return e * pl.reciprocal(jnp.sum(e, axis=-1, keepdims=True), approx=True)


# -----------------------------------------------------------------------------
# Fused kernel: one grid step == one batch element.
# -----------------------------------------------------------------------------
def _pin_fused_kernel(tw_ref,          # (1, G, G*Lmax) bf16  block-diag time-mean weights
                      kmask_ref,       # (1, G, G)      f32   instance-attn key mask
                      imw_ref,         # (1, P, G)      f32   per-path instance-mean weights
                      pmw_ref,         # (1, 1, P)      f32   path-mean weights (valid/n)
                      cmask_ref,       # (1, 1, Spad)   f32   candidate validity
                      x_ref,           # (1, G*Lmax, E) bf16  flattened instance embeddings
                      q_ref,           # (1, 1, E)      f32   query
                      cand_ref,        # (1, Spad, E)   bf16  padded candidate embeddings
                      conv_w_ref, conv_b_ref,    # (E, F) bf16, (1, F) f32
                      pi_w_ref, pi_b_ref,        # (4, F, F) bf16, (4, 1, F) f32  [Wq,Wk,Wv,Wo]
                      mp_w_ref, mp_b_ref,        # (4, F, F) bf16, (4, 1, F) f32
                      qi_w_ref, qi_b_ref,        # (2, F, F) bf16, (2, 1, F) f32  [Wv,Wo]
                      swq_ref, sw1_ref, sw2_ref, swc_ref, sb_ref,  # score-Linear slices
                      o_ref):          # (1, 1, Spad)   f32
    F = conv_w_ref.shape[1]
    scale = 1.0 / math.sqrt(F)
    bf16, f32 = jnp.bfloat16, jnp.float32

    # --- masked time-mean on the MXU: block-diag (G, G*L) @ (G*L, E) -> (G, E) ---
    mean_x = jnp.dot(tw_ref[0], x_ref[0], preferred_element_type=f32)

    # --- Conv1d(kernel_size=1) as one flat (G, E) @ (E, F) projection ---
    reprs = jnp.dot(mean_x.astype(bf16), conv_w_ref[...],
                    preferred_element_type=f32) + conv_b_ref[...]         # (G, F)

    # --- path-instance self-attention, all paths at once, block-diag key mask ---
    r16 = reprs.astype(bf16)
    q = jnp.dot(r16, pi_w_ref[0], preferred_element_type=f32) + pi_b_ref[0]
    k = jnp.dot(r16, pi_w_ref[1], preferred_element_type=f32) + pi_b_ref[1]
    v = jnp.dot(r16, pi_w_ref[2], preferred_element_type=f32) + pi_b_ref[2]
    s = lax.dot_general((q * scale).astype(bf16), k.astype(bf16),
                        (((1,), (1,)), ((), ())), preferred_element_type=f32)  # (G, G)
    s = jnp.where(kmask_ref[0] > 0.0, s, _NEG_BIG)
    attn = _masked_softmax_rows(s)
    ctx = jnp.dot(attn.astype(bf16), v.astype(bf16), preferred_element_type=f32)
    o = jnp.dot(ctx.astype(bf16), pi_w_ref[3], preferred_element_type=f32) + pi_b_ref[3]

    # --- masked mean over valid instances of each path: (P, G) @ (G, F) ---
    # Rows of invalid instances carry garbage but have zero weight here.
    mp = jnp.dot(imw_ref[0], o, preferred_element_type=f32)               # (P, F)

    # --- meta-path self-attention over valid paths, masked mean -> v1 ---
    pmw = pmw_ref[0]                                                      # (1, P)
    pvalid = pmw > 0.0
    mp16 = mp.astype(bf16)
    q2 = jnp.dot(mp16, mp_w_ref[0], preferred_element_type=f32) + mp_b_ref[0]
    k2 = jnp.dot(mp16, mp_w_ref[1], preferred_element_type=f32) + mp_b_ref[1]
    v2 = jnp.dot(mp16, mp_w_ref[2], preferred_element_type=f32) + mp_b_ref[2]
    s2 = lax.dot_general((q2 * scale).astype(bf16), k2.astype(bf16),
                         (((1,), (1,)), ((), ())), preferred_element_type=f32)  # (P, P)
    s2 = jnp.where(pvalid, s2, _NEG_BIG)
    attn2 = _masked_softmax_rows(s2)
    ctx2 = jnp.dot(attn2.astype(bf16), v2.astype(bf16), preferred_element_type=f32)
    v1 = jnp.dot(ctx2.astype(bf16), mp_w_ref[3], preferred_element_type=f32) + mp_b_ref[3]
    v1_agg = jnp.dot(pmw, v1, preferred_element_type=f32)                 # (1, F)

    # --- query / meta-path interaction attention, masked mean -> v2 ---
    # Each interaction attends a SINGLE key, so its softmax weight is exactly 1 and
    # the output reduces to (mp @ Wv + bv) @ Wo + bo (Wq/Wk cancel exactly).
    # TODO(synk): revisit if the interaction attention ever gets more than one key.
    vi = jnp.dot(mp16, qi_w_ref[0], preferred_element_type=f32) + qi_b_ref[0]
    inter = jnp.dot(vi.astype(bf16), qi_w_ref[1], preferred_element_type=f32) + qi_b_ref[1]
    v2_agg = jnp.dot(pmw, inter, preferred_element_type=f32)              # (1, F)

    # --- scoring Linear (decomposed) + masked softmax, lane-dense (1, Spad) ---
    qv = q_ref[0]                                                         # (1, E)
    const = (jnp.sum(qv * swq_ref[...], keepdims=True)
             + jnp.sum(v1_agg * sw1_ref[...], keepdims=True)
             + jnp.sum(v2_agg * sw2_ref[...], keepdims=True)
             + sb_ref[...])                                               # (1, 1)
    sc = lax.dot_general(swc_ref[...], cand_ref[0], (((1,), (1,)), ((), ())),
                         preferred_element_type=f32) + const              # (1, Spad)
    sc = jnp.where(cmask_ref[0] > 0.0, sc, _NEG_BIG)
    m3 = jnp.max(sc, axis=-1, keepdims=True)
    e3 = jnp.exp(sc - m3)
    # Exact normalization for the returned distribution (sums to 1; padded slots = 0).
    o_ref[0] = e3 / jnp.sum(e3, axis=-1, keepdims=True)


# -----------------------------------------------------------------------------
# Forward pass: one pallas_call launch + one device->host transfer.
# -----------------------------------------------------------------------------
def path_instance_network_forward(params, query, inst_emb, inst_len, cand_emb, cand_len):
    """query: (B, 1, E); inst_emb: (B, P, I, Lmax, E); inst_len: (B, P, I) host ints;
    cand_emb: (B, P, Cmax, E); cand_len: (B, P) host ints.
    Returns a list (len B) of 1-D softmax weight vectors, one per batch element."""
    B, P, I, Lmax, E = inst_emb.shape
    Cmax = cand_emb.shape[2]
    F = params["conv_w"].shape[1]
    G = P * I
    GL = G * Lmax
    S = P * Cmax
    Spad = max(128, ((S + 127) // 128) * 128)      # lane-dense candidate / output axis

    inst_len = np.asarray(inst_len, np.int32)       # (B, P, I)
    cand_len = np.asarray(cand_len, np.int32)       # (B, P)

    # ---- tiny host-precomputed mask / mean-weight tables (built once per call) ----
    ivalid = inst_len > 0                                                 # (B, P, I)
    tw = np.zeros((B, G, GL), np.float32)       # block-diag time-mean weights
    imw = np.zeros((B, P, G), np.float32)       # per-path instance-mean weights
    kmask = np.zeros((B, G, G), np.float32)     # instance-attn key mask
    for b in range(B):
        for p in range(P):
            nv = max(int(ivalid[b, p].sum()), 1)
            kmask[b, p * I:(p + 1) * I, p * I:(p + 1) * I] = \
                ivalid[b, p].astype(np.float32)[None, :]
            for i in range(I):
                g = p * I + i
                L = int(inst_len[b, p, i])
                if L > 0:
                    tw[b, g, g * Lmax: g * Lmax + L] = 1.0 / L
                    imw[b, p, g] = 1.0 / nv
    pvalid = ivalid.any(-1).astype(np.float32)                            # (B, P)
    n_path = np.maximum(pvalid.sum(-1, keepdims=True), 1.0)
    pmw = (pvalid / n_path).reshape(B, 1, P).astype(np.float32)           # (B, 1, P)
    cmask = np.zeros((B, 1, Spad), np.float32)
    for b in range(B):
        for p in range(P):
            cl = int(cand_len[b, p])
            cmask[b, 0, p * Cmax: p * Cmax + cl] = 1.0

    # ---- device inputs: bf16 matmul operands, f32 for masks / biases / scalars ----
    x_flat = inst_emb.reshape(B, GL, E).astype(jnp.bfloat16)
    cand_pad = jnp.pad(cand_emb.reshape(B, S, E),
                       ((0, 0), (0, Spad - S), (0, 0))).astype(jnp.bfloat16)
    sw = params["score_w"]                                                # (1, 2E + 2F)
    swq, sw1 = sw[:, :E], sw[:, E:E + F]
    sw2, swc = sw[:, E + F:E + 2 * F], sw[:, E + 2 * F:]
    conv_w = params["conv_w"].astype(jnp.bfloat16)
    pi_w = params["pi_w"].astype(jnp.bfloat16)
    mp_w = params["mp_w"].astype(jnp.bfloat16)
    qi_w = params["qi_w"][2:4].astype(jnp.bfloat16)   # only [Wv, Wo] are needed
    qi_b = params["qi_b"][2:4]

    c2 = lambda b: (0, 0)
    c3 = lambda b: (0, 0, 0)
    b3 = lambda b: (b, 0, 0)

    # NOTE: the constant-index weight blocks would ideally be single-buffered
    # (pipeline_mode=pl.Buffered(1)); at F=32 they are KB-sized so left default here.
    in_specs = [
        pl.BlockSpec((1, G, GL), b3),          # tw (bf16)
        pl.BlockSpec((1, G, G), b3),           # kmask
        pl.BlockSpec((1, P, G), b3),           # imw
        pl.BlockSpec((1, 1, P), b3),           # pmw
        pl.BlockSpec((1, 1, Spad), b3),        # cmask
        pl.BlockSpec((1, GL, E), b3),          # x (bf16)
        pl.BlockSpec((1, 1, E), b3),           # query
        pl.BlockSpec((1, Spad, E), b3),        # candidates (bf16)
        pl.BlockSpec((E, F), c2),              # conv_w (bf16)
        pl.BlockSpec((1, F), c2),              # conv_b
        pl.BlockSpec((4, F, F), c3),           # pi_w (bf16)
        pl.BlockSpec((4, 1, F), c3),           # pi_b
        pl.BlockSpec((4, F, F), c3),           # mp_w (bf16)
        pl.BlockSpec((4, 1, F), c3),           # mp_b
        pl.BlockSpec((2, F, F), c3),           # qi_w [Wv, Wo] (bf16)
        pl.BlockSpec((2, 1, F), c3),           # qi_b [bv, bo]
        pl.BlockSpec((1, E), c2),              # score_w . query slice
        pl.BlockSpec((1, F), c2),              # score_w . v1 slice
        pl.BlockSpec((1, F), c2),              # score_w . v2 slice
        pl.BlockSpec((1, E), c2),              # score_w . candidate slice (bf16)
        pl.BlockSpec((1, 1), c2),              # score_b
    ]

    w = pl.pallas_call(
        _pin_fused_kernel,
        out_shape=jax.ShapeDtypeStruct((B, 1, Spad), jnp.float32),
        grid=(B,),
        in_specs=in_specs,
        out_specs=pl.BlockSpec((1, 1, Spad), b3),
        compiler_params=pltpu.CompilerParams(
            dimension_semantics=("parallel",),
            # 32 MiB scoped VMEM is safe on v5e/v6e/v7x; re-derive for realistic
            # shapes (v7x has only 64 MiB physical VMEM per TensorCore).
            vmem_limit_bytes=32 * 1024 * 1024),
    )(jnp.asarray(tw).astype(jnp.bfloat16), jnp.asarray(kmask), jnp.asarray(imw),
      jnp.asarray(pmw), jnp.asarray(cmask),
      x_flat, query, cand_pad,
      conv_w, params["conv_b"], pi_w, params["pi_b"], mp_w, params["mp_b"],
      qi_w, qi_b, swq, sw1, sw2, swc.astype(jnp.bfloat16), params["score_b"])

    # ---- single device->host transfer; the ragged split happens on host ----
    w_host = np.asarray(jax.block_until_ready(w))[:, 0, :]                # (B, Spad)
    all_weights = []
    for b in range(B):
        idx = np.concatenate(
            [p * Cmax + np.arange(int(cand_len[b, p]))
             for p in range(P) if int(cand_len[b, p]) > 0])
        all_weights.append(w_host[b, idx])
    return all_weights


# -----------------------------------------------------------------------------
# Pure-JAX f32 reference (mirrors the PyTorch ragged control flow).
# -----------------------------------------------------------------------------
def _mha_ref(x_q, x_kv, w, b):
    # w: (4, D, D) = [Wq, Wk, Wv, Wo] in right-multiply layout, b: (4, 1, D).
    D = w.shape[-1]
    q = x_q @ w[0] + b[0]
    k = x_kv @ w[1] + b[1]
    v = x_kv @ w[2] + b[2]
    s = (q / math.sqrt(D)) @ k.T
    p = jax.nn.softmax(s, axis=-1)
    return (p @ v) @ w[3] + b[3]


def path_instance_network_forward_ref(params, query, inst_emb, inst_len, cand_emb, cand_len):
    B, P, I, Lmax, E = inst_emb.shape
    F = params["conv_w"].shape[1]
    inst_len = np.asarray(inst_len)
    cand_len = np.asarray(cand_len)
    all_weights = []
    for b in range(B):
        mp_list = []
        for p in range(P):
            reprs = []
            for i in range(I):
                L = int(inst_len[b, p, i])
                if L > 0:
                    xi = inst_emb[b, p, i, :L]                                  # (L, E)
                    r = (jnp.mean(xi, axis=0, keepdims=True) @ params["conv_w"]
                         + params["conv_b"])                                    # (1, F)
                    reprs.append(r)
            if reprs:
                R = jnp.concatenate(reprs, axis=0)
                a = _mha_ref(R, R, params["pi_w"], params["pi_b"])
                mp_list.append(jnp.mean(a, axis=0, keepdims=True))
        MP = jnp.concatenate(mp_list, axis=0)
        v1 = _mha_ref(MP, MP, params["mp_w"], params["mp_b"])
        v1_agg = jnp.mean(v1, axis=0, keepdims=True)
        qv = query[b]                                                           # (1, E)
        inters = [_mha_ref(qv, r, params["qi_w"], params["qi_b"]) for r in mp_list]
        v2_agg = jnp.mean(jnp.concatenate(inters, axis=0), axis=0, keepdims=True)
        cands = []
        for p in range(P):
            cl = int(cand_len[b, p])
            if cl > 0:
                cands.append(cand_emb[b, p, :cl])
        C = jnp.concatenate(cands, axis=0)
        Sb = C.shape[0]
        comb = jnp.concatenate([jnp.broadcast_to(qv, (Sb, E)),
                                jnp.broadcast_to(v1_agg, (Sb, F)),
                                jnp.broadcast_to(v2_agg, (Sb, F)), C], axis=-1)
        sc = comb @ params["score_w"].T + params["score_b"]                     # (Sb, 1)
        all_weights.append(jax.nn.softmax(sc[:, 0]))
    return all_weights


if __name__ == "__main__":
    E = 32   # embedding_dim
    F = 32   # num_filters (the module requires num_filters == embedding_dim for the
             # query/meta-path interaction attention)
    B, P, I, Lmax, Cmax = 2, 2, 3, 4, 5
    Din = 2 * E + 2 * F

    key = jax.random.PRNGKey(0)
    ks = jax.random.split(key, 16)

    params = {
        "conv_w":  0.1 * jax.random.normal(ks[0], (E, F), jnp.float32),
        "conv_b":  0.1 * jax.random.normal(ks[1], (1, F), jnp.float32),
        "pi_w":    0.1 * jax.random.normal(ks[2], (4, F, F), jnp.float32),
        "pi_b":    0.1 * jax.random.normal(ks[3], (4, 1, F), jnp.float32),
        "mp_w":    0.1 * jax.random.normal(ks[4], (4, F, F), jnp.float32),
        "mp_b":    0.1 * jax.random.normal(ks[5], (4, 1, F), jnp.float32),
        "qi_w":    0.1 * jax.random.normal(ks[6], (4, F, F), jnp.float32),
        "qi_b":    0.1 * jax.random.normal(ks[7], (4, 1, F), jnp.float32),
        "score_w": 0.1 * jax.random.normal(ks[8], (1, Din), jnp.float32),
        "score_b": 0.1 * jax.random.normal(ks[9], (1, 1), jnp.float32),
    }

    query = jax.random.normal(ks[10], (B, 1, E), jnp.float32)
    inst_emb = jax.random.normal(ks[11], (B, P, I, Lmax, E), jnp.float32)
    cand_emb = jax.random.normal(ks[12], (B, P, Cmax, E), jnp.float32)
    inst_len = np.array([[[4, 2, 3], [1, 0, 4]],
                         [[2, 3, 1], [4, 4, 2]]], dtype=np.int32)   # (B, P, I)
    cand_len = np.array([[3, 2], [4, 1]], dtype=np.int32)           # (B, P)

    out = path_instance_network_forward(params, query, inst_emb, inst_len,
                                        cand_emb, cand_len)

    ref = path_instance_network_forward_ref(params, query, inst_emb, inst_len,
                                            cand_emb, cand_len)
    for got, want in zip(out, ref):
        # Tolerance accounts for bf16 MXU operands (f32 accumulation) plus the
        # approx EUP reciprocal used inside the attention softmaxes; the final
        # candidate softmax itself is exactly normalized.
        np.testing.assert_allclose(np.asarray(got), np.asarray(want),
                                   rtol=3e-2, atol=2e-3)

    print("KERNEL_OK")
</pallas_src>

<mosaic_0001>
module attributes {stable_mosaic.version = 11 : i64} {
  func.func @_pin_fused_kernel(%arg0: i32, %arg1: memref<1x6x24xbf16, #tpu.memory_space<vmem>>, %arg2: memref<1x6x6xf32, #tpu.memory_space<vmem>>, %arg3: memref<1x2x6xf32, #tpu.memory_space<vmem>>, %arg4: memref<1x1x2xf32, #tpu.memory_space<vmem>>, %arg5: memref<1x1x128xf32, #tpu.memory_space<vmem>>, %arg6: memref<1x24x32xbf16, #tpu.memory_space<vmem>>, %arg7: memref<1x1x32xf32, #tpu.memory_space<vmem>>, %arg8: memref<1x128x32xbf16, #tpu.memory_space<vmem>>, %arg9: memref<32x32xbf16, #tpu.memory_space<vmem>>, %arg10: memref<1x32xf32, #tpu.memory_space<vmem>>, %arg11: memref<4x32x32xbf16, #tpu.memory_space<vmem>>, %arg12: memref<4x1x32xf32, #tpu.memory_space<vmem>>, %arg13: memref<4x32x32xbf16, #tpu.memory_space<vmem>>, %arg14: memref<4x1x32xf32, #tpu.memory_space<vmem>>, %arg15: memref<2x32x32xbf16, #tpu.memory_space<vmem>>, %arg16: memref<2x1x32xf32, #tpu.memory_space<vmem>>, %arg17: memref<1x32xf32, #tpu.memory_space<vmem>>, %arg18: memref<1x32xf32, #tpu.memory_space<vmem>>, %arg19: memref<1x32xf32, #tpu.memory_space<vmem>>, %arg20: memref<1x32xbf16, #tpu.memory_space<vmem>>, %arg21: memref<1x1xf32, #tpu.memory_space<vmem>>, %arg22: memref<1x1x128xf32, #tpu.memory_space<vmem>>) attributes {dimension_semantics = [#tpu.dimension_semantics<parallel>], iteration_bounds = array<i64: 2>, scalar_prefetch = 0 : i64, scratch_operands = 0 : i64, tpu.core_type = #tpu.core_type<tc>, window_params = [{transform_indices = @transform_0, window_bounds = array<i64: 1, 6, 24>}, {transform_indices = @transform_1, window_bounds = array<i64: 1, 6, 6>}, {transform_indices = @transform_2, window_bounds = array<i64: 1, 2, 6>}, {transform_indices = @transform_3, window_bounds = array<i64: 1, 1, 2>}, {transform_indices = @transform_4, window_bounds = array<i64: 1, 1, 128>}, {transform_indices = @transform_5, window_bounds = array<i64: 1, 24, 32>}, {transform_indices = @transform_6, window_bounds = array<i64: 1, 1, 32>}, {transform_indices = @transform_7, window_bounds = array<i64: 1, 128, 32>}, {pipeline_mode = #tpu.pipeline_mode<synchronous>, transform_indices = @transform_8, window_bounds = array<i64: 32, 32>}, {pipeline_mode = #tpu.pipeline_mode<synchronous>, transform_indices = @transform_9, window_bounds = array<i64: 1, 32>}, {pipeline_mode = #tpu.pipeline_mode<synchronous>, transform_indices = @transform_10, window_bounds = array<i64: 4, 32, 32>}, {pipeline_mode = #tpu.pipeline_mode<synchronous>, transform_indices = @transform_11, window_bounds = array<i64: 4, 1, 32>}, {pipeline_mode = #tpu.pipeline_mode<synchronous>, transform_indices = @transform_12, window_bounds = array<i64: 4, 32, 32>}, {pipeline_mode = #tpu.pipeline_mode<synchronous>, transform_indices = @transform_13, window_bounds = array<i64: 4, 1, 32>}, {pipeline_mode = #tpu.pipeline_mode<synchronous>, transform_indices = @transform_14, window_bounds = array<i64: 2, 32, 32>}, {pipeline_mode = #tpu.pipeline_mode<synchronous>, transform_indices = @transform_15, window_bounds = array<i64: 2, 1, 32>}, {pipeline_mode = #tpu.pipeline_mode<synchronous>, transform_indices = @transform_16, window_bounds = array<i64: 1, 32>}, {pipeline_mode = #tpu.pipeline_mode<synchronous>, transform_indices = @transform_17, window_bounds = array<i64: 1, 32>}, {pipeline_mode = #tpu.pipeline_mode<synchronous>, transform_indices = @transform_18, window_bounds = array<i64: 1, 32>}, {pipeline_mode = #tpu.pipeline_mode<synchronous>, transform_indices = @transform_19, window_bounds = array<i64: 1, 32>}, {pipeline_mode = #tpu.pipeline_mode<synchronous>, transform_indices = @transform_20, window_bounds = array<i64: 1, 1>}, {transform_indices = @transform_21, window_bounds = array<i64: 1, 1, 128>}]} {
    %c0 = arith.constant 0 : index
    %c0_0 = arith.constant 0 : index
    %c0_1 = arith.constant 0 : index
    %0 = vector.load %arg1[%c0, %c0_0, %c0_1] : memref<1x6x24xbf16, #tpu.memory_space<vmem>>, vector<1x6x24xbf16>
    %1 = vector.shape_cast %0 : vector<1x6x24xbf16> to vector<6x24xbf16>
    %c0_2 = arith.constant 0 : index
    %c0_3 = arith.constant 0 : index
    %c0_4 = arith.constant 0 : index
    %2 = vector.load %arg6[%c0_2, %c0_3, %c0_4] : memref<1x24x32xbf16, #tpu.memory_space<vmem>>, vector<1x24x32xbf16>
    %3 = vector.shape_cast %2 : vector<1x24x32xbf16> to vector<24x32xbf16>
    %cst = arith.constant dense<0.000000e+00> : vector<6x32xf32>
    %4 = tpu.matmul %1, %3, %cst {dimension_numbers = #tpu.dot_dimension_numbers<[1], [0], [0], [1], [0, 0, 1, 1], [], []>} : vector<6x24xbf16>, vector<24x32xbf16>, vector<6x32xf32> -> vector<6x32xf32>
    %5 = arith.truncf %4 : vector<6x32xf32> to vector<6x32xbf16>
    %c0_5 = arith.constant 0 : index
    %c0_6 = arith.constant 0 : index
    %6 = vector.load %arg9[%c0_5, %c0_6] : memref<32x32xbf16, #tpu.memory_space<vmem>>, vector<32x32xbf16>
    %cst_7 = arith.constant dense<0.000000e+00> : vector<6x32xf32>
    %7 = tpu.matmul %5, %6, %cst_7 {dimension_numbers = #tpu.dot_dimension_numbers<[1], [0], [0], [1], [0, 0, 1, 1], [], []>} : vector<6x32xbf16>, vector<32x32xbf16>, vector<6x32xf32> -> vector<6x32xf32>
    %c0_8 = arith.constant 0 : index
    %c0_9 = arith.constant 0 : index
    %8 = vector.load %arg10[%c0_8, %c0_9] : memref<1x32xf32, #tpu.memory_space<vmem>>, vector<1x32xf32>
    %9 = vector.broadcast %8 : vector<1x32xf32> to vector<6x32xf32>
    %10 = arith.addf %7, %9 : vector<6x32xf32>
    %11 = arith.truncf %10 : vector<6x32xf32> to vector<6x32xbf16>
    %c0_10 = arith.constant 0 : index
    %c0_11 = arith.constant 0 : index
    %c0_12 = arith.constant 0 : index
    %12 = vector.load %arg11[%c0_10, %c0_11, %c0_12] : memref<4x32x32xbf16, #tpu.memory_space<vmem>>, vector<1x32x32xbf16>
    %13 = vector.shape_cast %12 : vector<1x32x32xbf16> to vector<32x32xbf16>
    %cst_13 = arith.constant dense<0.000000e+00> : vector<6x32xf32>
    %14 = tpu.matmul %11, %13, %cst_13 {dimension_numbers = #tpu.dot_dimension_numbers<[1], [0], [0], [1], [0, 0, 1, 1], [], []>} : vector<6x32xbf16>, vector<32x32xbf16>, vector<6x32xf32> -> vector<6x32xf32>
    %c0_14 = arith.constant 0 : index
    %c0_15 = arith.constant 0 : index
    %c0_16 = arith.constant 0 : index
    %15 = vector.load %arg12[%c0_14, %c0_15, %c0_16] : memref<4x1x32xf32, #tpu.memory_space<vmem>>, vector<1x1x32xf32>
    %16 = vector.shape_cast %15 : vector<1x1x32xf32> to vector<1x32xf32>
    %17 = vector.broadcast %16 : vector<1x32xf32> to vector<6x32xf32>
    %18 = arith.addf %14, %17 : vector<6x32xf32>
    %c1 = arith.constant 1 : index
    %c0_17 = arith.constant 0 : index
    %c0_18 = arith.constant 0 : index
    %19 = vector.load %arg11[%c1, %c0_17, %c0_18] : memref<4x32x32xbf16, #tpu.memory_space<vmem>>, vector<1x32x32xbf16>
    %20 = vector.shape_cast %19 : vector<1x32x32xbf16> to vector<32x32xbf16>
    %cst_19 = arith.constant dense<0.000000e+00> : vector<6x32xf32>
    %21 = tpu.matmul %11, %20, %cst_19 {dimension_numbers = #tpu.dot_dimension_numbers<[1], [0], [0], [1], [0, 0, 1, 1], [], []>} : vector<6x32xbf16>, vector<32x32xbf16>, vector<6x32xf32> -> vector<6x32xf32>
    %c1_20 = arith.constant 1 : index
    %c0_21 = arith.constant 0 : index
    %c0_22 = arith.constant 0 : index
    %22 = vector.load %arg12[%c1_20, %c0_21, %c0_22] : memref<4x1x32xf32, #tpu.memory_space<vmem>>, vector<1x1x32xf32>
    %23 = vector.shape_cast %22 : vector<1x1x32xf32> to vector<1x32xf32>
    %24 = vector.broadcast %23 : vector<1x32xf32> to vector<6x32xf32>
    %25 = arith.addf %21, %24 : vector<6x32xf32>
    %c2 = arith.constant 2 : index
    %c0_23 = arith.constant 0 : index
    %c0_24 = arith.constant 0 : index
    %26 = vector.load %arg11[%c2, %c0_23, %c0_24] : memref<4x32x32xbf16, #tpu.memory_space<vmem>>, vector<1x32x32xbf16>
    %27 = vector.shape_cast %26 : vector<1x32x32xbf16> to vector<32x32xbf16>
    %cst_25 = arith.constant dense<0.000000e+00> : vector<6x32xf32>
    %28 = tpu.matmul %11, %27, %cst_25 {dimension_numbers = #tpu.dot_dimension_numbers<[1], [0], [0], [1], [0, 0, 1, 1], [], []>} : vector<6x32xbf16>, vector<32x32xbf16>, vector<6x32xf32> -> vector<6x32xf32>
    %c2_26 = arith.constant 2 : index
    %c0_27 = arith.constant 0 : index
    %c0_28 = arith.constant 0 : index
    %29 = vector.load %arg12[%c2_26, %c0_27, %c0_28] : memref<4x1x32xf32, #tpu.memory_space<vmem>>, vector<1x1x32xf32>
    %30 = vector.shape_cast %29 : vector<1x1x32xf32> to vector<1x32xf32>
    %31 = vector.broadcast %30 : vector<1x32xf32> to vector<6x32xf32>
    %32 = arith.addf %28, %31 : vector<6x32xf32>
    %cst_29 = arith.constant 0.176776692 : f32
    %33 = vector.broadcast %cst_29 : f32 to vector<6x32xf32>
    %34 = arith.mulf %18, %33 : vector<6x32xf32>
    %35 = arith.truncf %34 : vector<6x32xf32> to vector<6x32xbf16>
    %36 = arith.truncf %25 : vector<6x32xf32> to vector<6x32xbf16>
    %cst_30 = arith.constant dense<0.000000e+00> : vector<6x6xf32>
    %37 = tpu.matmul %35, %36, %cst_30 {dimension_numbers = #tpu.dot_dimension_numbers<[1], [1], [0], [0], [0, 0, 1, 0], [], []>} : vector<6x32xbf16>, vector<6x32xbf16>, vector<6x6xf32> -> vector<6x6xf32>
    %c0_31 = arith.constant 0 : index
    %c0_32 = arith.constant 0 : index
    %c0_33 = arith.constant 0 : index
    %38 = vector.load %arg2[%c0_31, %c0_32, %c0_33] : memref<1x6x6xf32, #tpu.memory_space<vmem>>, vector<1x6x6xf32>
    %39 = vector.shape_cast %38 : vector<1x6x6xf32> to vector<6x6xf32>
    %cst_34 = arith.constant 0.000000e+00 : f32
    %40 = vector.broadcast %cst_34 : f32 to vector<6x6xf32>
    %41 = arith.cmpf ogt, %39, %40 : vector<6x6xf32>
    %cst_35 = arith.constant -1.000000e+30 : f32
    %42 = vector.broadcast %cst_35 : f32 to vector<6x6xf32>
    %43 = arith.select %41, %37, %42 : vector<6x6xi1>, vector<6x6xf32>
    %cst_36 = arith.constant dense<0xFF800000> : vector<6xf32>
    %44 = vector.multi_reduction <maximumf>, %43, %cst_36 [1] : vector<6x6xf32> to vector<6xf32>
    %45 = vector.shape_cast %44 : vector<6xf32> to vector<6x1xf32>
    %46 = vector.broadcast %45 : vector<6x1xf32> to vector<6x6xf32>
    %47 = arith.subf %43, %46 : vector<6x6xf32>
    %48 = math.exp %47 : vector<6x6xf32>
    %cst_37 = arith.constant dense<0.000000e+00> : vector<6xf32>
    %49 = vector.multi_reduction <add>, %48, %cst_37 [1] : vector<6x6xf32> to vector<6xf32>
    %50 = vector.shape_cast %49 : vector<6xf32> to vector<6x1xf32>
    %51 = tpu.reciprocal %50 {approx = true} : vector<6x1xf32> -> vector<6x1xf32>
    %52 = vector.broadcast %51 : vector<6x1xf32> to vector<6x6xf32>
    %53 = arith.mulf %48, %52 : vector<6x6xf32>
    %54 = arith.truncf %53 : vector<6x6xf32> to vector<6x6xbf16>
    %55 = arith.truncf %32 : vector<6x32xf32> to vector<6x32xbf16>
    %cst_38 = arith.constant dense<0.000000e+00> : vector<6x32xf32>
    %56 = tpu.matmul %54, %55, %cst_38 {dimension_numbers = #tpu.dot_dimension_numbers<[1], [0], [0], [1], [0, 0, 1, 1], [], []>} : vector<6x6xbf16>, vector<6x32xbf16>, vector<6x32xf32> -> vector<6x32xf32>
    %57 = arith.truncf %56 : vector<6x32xf32> to vector<6x32xbf16>
    %c3 = arith.constant 3 : index
    %c0_39 = arith.constant 0 : index
    %c0_40 = arith.constant 0 : index
    %58 = vector.load %arg11[%c3, %c0_39, %c0_40] : memref<4x32x32xbf16, #tpu.memory_space<vmem>>, vector<1x32x32xbf16>
    %59 = vector.shape_cast %58 : vector<1x32x32xbf16> to vector<32x32xbf16>
    %cst_41 = arith.constant dense<0.000000e+00> : vector<6x32xf32>
    %60 = tpu.matmul %57, %59, %cst_41 {dimension_numbers = #tpu.dot_dimension_numbers<[1], [0], [0], [1], [0, 0, 1, 1], [], []>} : vector<6x32xbf16>, vector<32x32xbf16>, vector<6x32xf32> -> vector<6x32xf32>
    %c3_42 = arith.constant 3 : index
    %c0_43 = arith.constant 0 : index
    %c0_44 = arith.constant 0 : index
    %61 = vector.load %arg12[%c3_42, %c0_43, %c0_44] : memref<4x1x32xf32, #tpu.memory_space<vmem>>, vector<1x1x32xf32>
    %62 = vector.shape_cast %61 : vector<1x1x32xf32> to vector<1x32xf32>
    %63 = vector.broadcast %62 : vector<1x32xf32> to vector<6x32xf32>
    %64 = arith.addf %60, %63 : vector<6x32xf32>
    %c0_45 = arith.constant 0 : index
    %c0_46 = arith.constant 0 : index
    %c0_47 = arith.constant 0 : index
    %65 = vector.load %arg3[%c0_45, %c0_46, %c0_47] : memref<1x2x6xf32, #tpu.memory_space<vmem>>, vector<1x2x6xf32>
    %66 = vector.shape_cast %65 : vector<1x2x6xf32> to vector<2x6xf32>
    %cst_48 = arith.constant dense<0.000000e+00> : vector<2x32xf32>
    %67 = tpu.matmul %66, %64, %cst_48 {dimension_numbers = #tpu.dot_dimension_numbers<[1], [0], [0], [1], [0, 0, 1, 1], [], []>} : vector<2x6xf32>, vector<6x32xf32>, vector<2x32xf32> -> vector<2x32xf32>
    %c0_49 = arith.constant 0 : index
    %c0_50 = arith.constant 0 : index
    %c0_51 = arith.constant 0 : index
    %68 = vector.load %arg4[%c0_49, %c0_50, %c0_51] : memref<1x1x2xf32, #tpu.memory_space<vmem>>, vector<1x1x2xf32>
    %69 = vector.shape_cast %68 : vector<1x1x2xf32> to vector<1x2xf32>
    %cst_52 = arith.constant 0.000000e+00 : f32
    %70 = vector.broadcast %cst_52 : f32 to vector<1x2xf32>
    %71 = arith.cmpf ogt, %69, %70 : vector<1x2xf32>
    %72 = arith.truncf %67 : vector<2x32xf32> to vector<2x32xbf16>
    %c0_53 = arith.constant 0 : index
    %c0_54 = arith.constant 0 : index
    %c0_55 = arith.constant 0 : index
    %73 = vector.load %arg13[%c0_53, %c0_54, %c0_55] : memref<4x32x32xbf16, #tpu.memory_space<vmem>>, vector<1x32x32xbf16>
    %74 = vector.shape_cast %73 : vector<1x32x32xbf16> to vector<32x32xbf16>
    %cst_56 = arith.constant dense<0.000000e+00> : vector<2x32xf32>
    %75 = tpu.matmul %72, %74, %cst_56 {dimension_numbers = #tpu.dot_dimension_numbers<[1], [0], [0], [1], [0, 0, 1, 1], [], []>} : vector<2x32xbf16>, vector<32x32xbf16>, vector<2x32xf32> -> vector<2x32xf32>
    %c0_57 = arith.constant 0 : index
    %c0_58 = arith.constant 0 : index
    %c0_59 = arith.constant 0 : index
    %76 = vector.load %arg14[%c0_57, %c0_58, %c0_59] : memref<4x1x32xf32, #tpu.memory_space<vmem>>, vector<1x1x32xf32>
    %77 = vector.shape_cast %76 : vector<1x1x32xf32> to vector<1x32xf32>
    %78 = vector.broadcast %77 : vector<1x32xf32> to vector<2x32xf32>
    %79 = arith.addf %75, %78 : vector<2x32xf32>
    %c1_60 = arith.constant 1 : index
    %c0_61 = arith.constant 0 : index
    %c0_62 = arith.constant 0 : index
    %80 = vector.load %arg13[%c1_60, %c0_61, %c0_62] : memref<4x32x32xbf16, #tpu.memory_space<vmem>>, vector<1x32x32xbf16>
    %81 = vector.shape_cast %80 : vector<1x32x32xbf16> to vector<32x32xbf16>
    %cst_63 = arith.constant dense<0.000000e+00> : vector<2x32xf32>
    %82 = tpu.matmul %72, %81, %cst_63 {dimension_numbers = #tpu.dot_dimension_numbers<[1], [0], [0], [1], [0, 0, 1, 1], [], []>} : vector<2x32xbf16>, vector<32x32xbf16>, vector<2x32xf32> -> vector<2x32xf32>
    %c1_64 = arith.constant 1 : index
    %c0_65 = arith.constant 0 : index
    %c0_66 = arith.constant 0 : index
    %83 = vector.load %arg14[%c1_64, %c0_65, %c0_66] : memref<4x1x32xf32, #tpu.memory_space<vmem>>, vector<1x1x32xf32>
    %84 = vector.shape_cast %83 : vector<1x1x32xf32> to vector<1x32xf32>
    %85 = vector.broadcast %84 : vector<1x32xf32> to vector<2x32xf32>
    %86 = arith.addf %82, %85 : vector<2x32xf32>
    %c2_67 = arith.constant 2 : index
    %c0_68 = arith.constant 0 : index
    %c0_69 = arith.constant 0 : index
    %87 = vector.load %arg13[%c2_67, %c0_68, %c0_69] : memref<4x32x32xbf16, #tpu.memory_space<vmem>>, vector<1x32x32xbf16>
    %88 = vector.shape_cast %87 : vector<1x32x32xbf16> to vector<32x32xbf16>
    %cst_70 = arith.constant dense<0.000000e+00> : vector<2x32xf32>
    %89 = tpu.matmul %72, %88, %cst_70 {dimension_numbers = #tpu.dot_dimension_numbers<[1], [0], [0], [1], [0, 0, 1, 1], [], []>} : vector<2x32xbf16>, vector<32x32xbf16>, vector<2x32xf32> -> vector<2x32xf32>
    %c2_71 = arith.constant 2 : index
    %c0_72 = arith.constant 0 : index
    %c0_73 = arith.constant 0 : index
    %90 = vector.load %arg14[%c2_71, %c0_72, %c0_73] : memref<4x1x32xf32, #tpu.memory_space<vmem>>, vector<1x1x32xf32>
    %91 = vector.shape_cast %90 : vector<1x1x32xf32> to vector<1x32xf32>
    %92 = vector.broadcast %91 : vector<1x32xf32> to vector<2x32xf32>
    %93 = arith.addf %89, %92 : vector<2x32xf32>
    %cst_74 = arith.constant 0.176776692 : f32
    %94 = vector.broadcast %cst_74 : f32 to vector<2x32xf32>
    %95 = arith.mulf %79, %94 : vector<2x32xf32>
    %96 = arith.truncf %95 : vector<2x32xf32> to vector<2x32xbf16>
    %97 = arith.truncf %86 : vector<2x32xf32> to vector<2x32xbf16>
    %cst_75 = arith.constant dense<0.000000e+00> : vector<2x2xf32>
    %98 = tpu.matmul %96, %97, %cst_75 {dimension_numbers = #tpu.dot_dimension_numbers<[1], [1], [0], [0], [0, 0, 1, 0], [], []>} : vector<2x32xbf16>, vector<2x32xbf16>, vector<2x2xf32> -> vector<2x2xf32>
    %cst_76 = arith.constant -1.000000e+30 : f32
    %99 = vector.shape_cast %71 : vector<1x2xi1> to vector<1x2xi1>
    %100 = vector.broadcast %99 : vector<1x2xi1> to vector<2x2xi1>
    %101 = vector.broadcast %cst_76 : f32 to vector<2x2xf32>
    %102 = arith.select %100, %98, %101 : vector<2x2xi1>, vector<2x2xf32>
    %cst_77 = arith.constant dense<0xFF800000> : vector<2xf32>
    %103 = vector.multi_reduction <maximumf>, %102, %cst_77 [1] : vector<2x2xf32> to vector<2xf32>
    %104 = vector.shape_cast %103 : vector<2xf32> to vector<2x1xf32>
    %105 = vector.broadcast %104 : vector<2x1xf32> to vector<2x2xf32>
    %106 = arith.subf %102, %105 : vector<2x2xf32>
    %107 = math.exp %106 : vector<2x2xf32>
    %cst_78 = arith.constant dense<0.000000e+00> : vector<2xf32>
    %108 = vector.multi_reduction <add>, %107, %cst_78 [1] : vector<2x2xf32> to vector<2xf32>
    %109 = vector.shape_cast %108 : vector<2xf32> to vector<2x1xf32>
    %110 = tpu.reciprocal %109 {approx = true} : vector<2x1xf32> -> vector<2x1xf32>
    %111 = vector.broadcast %110 : vector<2x1xf32> to vector<2x2xf32>
    %112 = arith.mulf %107, %111 : vector<2x2xf32>
    %113 = arith.truncf %112 : vector<2x2xf32> to vector<2x2xbf16>
    %114 = arith.truncf %93 : vector<2x32xf32> to vector<2x32xbf16>
    %cst_79 = arith.constant dense<0.000000e+00> : vector<2x32xf32>
    %115 = tpu.matmul %113, %114, %cst_79 {dimension_numbers = #tpu.dot_dimension_numbers<[1], [0], [0], [1], [0, 0, 1, 1], [], []>} : vector<2x2xbf16>, vector<2x32xbf16>, vector<2x32xf32> -> vector<2x32xf32>
    %116 = arith.truncf %115 : vector<2x32xf32> to vector<2x32xbf16>
    %c3_80 = arith.constant 3 : index
    %c0_81 = arith.constant 0 : index
    %c0_82 = arith.constant 0 : index
    %117 = vector.load %arg13[%c3_80, %c0_81, %c0_82] : memref<4x32x32xbf16, #tpu.memory_space<vmem>>, vector<1x32x32xbf16>
    %118 = vector.shape_cast %117 : vector<1x32x32xbf16> to vector<32x32xbf16>
    %cst_83 = arith.constant dense<0.000000e+00> : vector<2x32xf32>
    %119 = tpu.matmul %116, %118, %cst_83 {dimension_numbers = #tpu.dot_dimension_numbers<[1], [0], [0], [1], [0, 0, 1, 1], [], []>} : vector<2x32xbf16>, vector<32x32xbf16>, vector<2x32xf32> -> vector<2x32xf32>
    %c3_84 = arith.constant 3 : index
    %c0_85 = arith.constant 0 : index
    %c0_86 = arith.constant 0 : index
    %120 = vector.load %arg14[%c3_84, %c0_85, %c0_86] : memref<4x1x32xf32, #tpu.memory_space<vmem>>, vector<1x1x32xf32>
    %121 = vector.shape_cast %120 : vector<1x1x32xf32> to vector<1x32xf32>
    %122 = vector.broadcast %121 : vector<1x32xf32> to vector<2x32xf32>
    %123 = arith.addf %119, %122 : vector<2x32xf32>
    %cst_87 = arith.constant dense<0.000000e+00> : vector<1x32xf32>
    %124 = tpu.matmul %69, %123, %cst_87 {dimension_numbers = #tpu.dot_dimension_numbers<[1], [0], [0], [1], [0, 0, 1, 1], [], []>} : vector<1x2xf32>, vector<2x32xf32>, vector<1x32xf32> -> vector<1x32xf32>
    %c0_88 = arith.constant 0 : index
    %c0_89 = arith.constant 0 : index
    %c0_90 = arith.constant 0 : index
    %125 = vector.load %arg15[%c0_88, %c0_89, %c0_90] : memref<2x32x32xbf16, #tpu.memory_space<vmem>>, vector<1x32x32xbf16>
    %126 = vector.shape_cast %125 : vector<1x32x32xbf16> to vector<32x32xbf16>
    %cst_91 = arith.constant dense<0.000000e+00> : vector<2x32xf32>
    %127 = tpu.matmul %72, %126, %cst_91 {dimension_numbers = #tpu.dot_dimension_numbers<[1], [0], [0], [1], [0, 0, 1, 1], [], []>} : vector<2x32xbf16>, vector<32x32xbf16>, vector<2x32xf32> -> vector<2x32xf32>
    %c0_92 = arith.constant 0 : index
    %c0_93 = arith.constant 0 : index
    %c0_94 = arith.constant 0 : index
    %128 = vector.load %arg16[%c0_92, %c0_93, %c0_94] : memref<2x1x32xf32, #tpu.memory_space<vmem>>, vector<1x1x32xf32>
    %129 = vector.shape_cast %128 : vector<1x1x32xf32> to vector<1x32xf32>
    %130 = vector.broadcast %129 : vector<1x32xf32> to vector<2x32xf32>
    %131 = arith.addf %127, %130 : vector<2x32xf32>
    %132 = arith.truncf %131 : vector<2x32xf32> to vector<2x32xbf16>
    %c1_95 = arith.constant 1 : index
    %c0_96 = arith.constant 0 : index
    %c0_97 = arith.constant 0 : index
    %133 = vector.load %arg15[%c1_95, %c0_96, %c0_97] : memref<2x32x32xbf16, #tpu.memory_space<vmem>>, vector<1x32x32xbf16>
    %134 = vector.shape_cast %133 : vector<1x32x32xbf16> to vector<32x32xbf16>
    %cst_98 = arith.constant dense<0.000000e+00> : vector<2x32xf32>
    %135 = tpu.matmul %132, %134, %cst_98 {dimension_numbers = #tpu.dot_dimension_numbers<[1], [0], [0], [1], [0, 0, 1, 1], [], []>} : vector<2x32xbf16>, vector<32x32xbf16>, vector<2x32xf32> -> vector<2x32xf32>
    %c1_99 = arith.constant 1 : index
    %c0_100 = arith.constant 0 : index
    %c0_101 = arith.constant 0 : index
    %136 = vector.load %arg16[%c1_99, %c0_100, %c0_101] : memref<2x1x32xf32, #tpu.memory_space<vmem>>, vector<1x1x32xf32>
    %137 = vector.shape_cast %136 : vector<1x1x32xf32> to vector<1x32xf32>
    %138 = vector.broadcast %137 : vector<1x32xf32> to vector<2x32xf32>
    %139 = arith.addf %135, %138 : vector<2x32xf32>
    %cst_102 = arith.constant dense<0.000000e+00> : vector<1x32xf32>
    %140 = tpu.matmul %69, %139, %cst_102 {dimension_numbers = #tpu.dot_dimension_numbers<[1], [0], [0], [1], [0, 0, 1, 1], [], []>} : vector<1x2xf32>, vector<2x32xf32>, vector<1x32xf32> -> vector<1x32xf32>
    %c0_103 = arith.constant 0 : index
    %c0_104 = arith.constant 0 : index
    %c0_105 = arith.constant 0 : index
    %141 = vector.load %arg7[%c0_103, %c0_104, %c0_105] : memref<1x1x32xf32, #tpu.memory_space<vmem>>, vector<1x1x32xf32>
    %142 = vector.shape_cast %141 : vector<1x1x32xf32> to vector<1x32xf32>
    %c0_106 = arith.constant 0 : index
    %c0_107 = arith.constant 0 : index
    %143 = vector.load %arg17[%c0_106, %c0_107] : memref<1x32xf32, #tpu.memory_space<vmem>>, vector<1x32xf32>
    %144 = arith.mulf %142, %143 : vector<1x32xf32>
    %145 = vector.shape_cast %144 : vector<1x32xf32> to vector<1x1x32xf32>
    %cst_108 = arith.constant dense<0.000000e+00> : vector<1xf32>
    %146 = vector.multi_reduction <add>, %145, %cst_108 [1, 2] : vector<1x1x32xf32> to vector<1xf32>
    %147 = vector.shape_cast %146 : vector<1xf32> to vector<1x1x1xf32>
    %148 = vector.extract %147[0, 0, 0] : f32 from vector<1x1x1xf32>
    %149 = vector.broadcast %148 : f32 to vector<1x1xf32>
    %c0_109 = arith.constant 0 : index
    %c0_110 = arith.constant 0 : index
    %150 = vector.load %arg18[%c0_109, %c0_110] : memref<1x32xf32, #tpu.memory_space<vmem>>, vector<1x32xf32>
    %151 = arith.mulf %124, %150 : vector<1x32xf32>
    %152 = vector.shape_cast %151 : vector<1x32xf32> to vector<1x1x32xf32>
    %cst_111 = arith.constant dense<0.000000e+00> : vector<1xf32>
    %153 = vector.multi_reduction <add>, %152, %cst_111 [1, 2] : vector<1x1x32xf32> to vector<1xf32>
    %154 = vector.shape_cast %153 : vector<1xf32> to vector<1x1x1xf32>
    %155 = vector.extract %154[0, 0, 0] : f32 from vector<1x1x1xf32>
    %156 = vector.broadcast %155 : f32 to vector<1x1xf32>
    %157 = arith.addf %149, %156 : vector<1x1xf32>
    %c0_112 = arith.constant 0 : index
    %c0_113 = arith.constant 0 : index
    %158 = vector.load %arg19[%c0_112, %c0_113] : memref<1x32xf32, #tpu.memory_space<vmem>>, vector<1x32xf32>
    %159 = arith.mulf %140, %158 : vector<1x32xf32>
    %160 = vector.shape_cast %159 : vector<1x32xf32> to vector<1x1x32xf32>
    %cst_114 = arith.constant dense<0.000000e+00> : vector<1xf32>
    %161 = vector.multi_reduction <add>, %160, %cst_114 [1, 2] : vector<1x1x32xf32> to vector<1xf32>
    %162 = vector.shape_cast %161 : vector<1xf32> to vector<1x1x1xf32>
    %163 = vector.extract %162[0, 0, 0] : f32 from vector<1x1x1xf32>
    %164 = vector.broadcast %163 : f32 to vector<1x1xf32>
    %165 = arith.addf %157, %164 : vector<1x1xf32>
    %c0_115 = arith.constant 0 : index
    %c0_116 = arith.constant 0 : index
    %166 = vector.load %arg21[%c0_115, %c0_116] : memref<1x1xf32, #tpu.memory_space<vmem>>, vector<1x1xf32>
    %167 = arith.addf %165, %166 : vector<1x1xf32>
    %c0_117 = arith.constant 0 : index
    %c0_118 = arith.constant 0 : index
    %168 = vector.load %arg20[%c0_117, %c0_118] : memref<1x32xbf16, #tpu.memory_space<vmem>>, vector<1x32xbf16>
    %c0_119 = arith.constant 0 : index
    %c0_120 = arith.constant 0 : index
    %c0_121 = arith.constant 0 : index
    %169 = vector.load %arg8[%c0_119, %c0_120, %c0_121] : memref<1x128x32xbf16, #tpu.memory_space<vmem>>, vector<1x128x32xbf16>
    %170 = vector.shape_cast %169 : vector<1x128x32xbf16> to vector<128x32xbf16>
    %cst_122 = arith.constant dense<0.000000e+00> : vector<1x128xf32>
    %171 = tpu.matmul %168, %170, %cst_122 {dimension_numbers = #tpu.dot_dimension_numbers<[1], [1], [0], [0], [0, 0, 1, 0], [], []>} : vector<1x32xbf16>, vector<128x32xbf16>, vector<1x128xf32> -> vector<1x128xf32>
    %172 = vector.broadcast %167 : vector<1x1xf32> to vector<1x128xf32>
    %173 = arith.addf %171, %172 : vector<1x128xf32>
    %c0_123 = arith.constant 0 : index
    %c0_124 = arith.constant 0 : index
    %c0_125 = arith.constant 0 : index
    %174 = vector.load %arg5[%c0_123, %c0_124, %c0_125] : memref<1x1x128xf32, #tpu.memory_space<vmem>>, vector<1x1x128xf32>
    %175 = vector.shape_cast %174 : vector<1x1x128xf32> to vector<1x128xf32>
    %cst_126 = arith.constant 0.000000e+00 : f32
    %176 = vector.broadcast %cst_126 : f32 to vector<1x128xf32>
    %177 = arith.cmpf ogt, %175, %176 : vector<1x128xf32>
    %cst_127 = arith.constant -1.000000e+30 : f32
    %178 = vector.broadcast %cst_127 : f32 to vector<1x128xf32>
    %179 = arith.select %177, %173, %178 : vector<1x128xi1>, vector<1x128xf32>
    %cst_128 = arith.constant dense<0xFF800000> : vector<1xf32>
    %180 = vector.multi_reduction <maximumf>, %179, %cst_128 [1] : vector<1x128xf32> to vector<1xf32>
    %181 = vector.shape_cast %180 : vector<1xf32> to vector<1x1xf32>
    %182 = vector.broadcast %181 : vector<1x1xf32> to vector<1x128xf32>
    %183 = arith.subf %179, %182 : vector<1x128xf32>
    %184 = math.exp %183 : vector<1x128xf32>
    %cst_129 = arith.constant dense<0.000000e+00> : vector<1xf32>
    %185 = vector.multi_reduction <add>, %184, %cst_129 [1] : vector<1x128xf32> to vector<1xf32>
    %186 = vector.shape_cast %185 : vector<1xf32> to vector<1x1xf32>
    %187 = vector.broadcast %186 : vector<1x1xf32> to vector<1x128xf32>
    %188 = arith.divf %184, %187 : vector<1x128xf32>
    %c0_130 = arith.constant 0 : index
    %c0_131 = arith.constant 0 : index
    %c0_132 = arith.constant 0 : index
    %189 = vector.load %arg22[%c0_130, %c0_131, %c0_132] : memref<1x1x128xf32, #tpu.memory_space<vmem>>, vector<1x1x128xf32>
    %190 = vector.shape_cast %189 : vector<1x1x128xf32> to vector<1x128xf32>
    %191 = vector.shape_cast %188 : vector<1x128xf32> to vector<1x1x128xf32>
    tpu.vector_store %arg22[%c0_130, %c0_131, %c0_132], %191 {strides = array<i32>} : memref<1x1x128xf32, #tpu.memory_space<vmem>>, vector<1x1x128xf32>,
    return
  }
  func.func @transform_0(%arg0: i32) -> (i32, i32, i32) {
    %c0_i32 = arith.constant 0 : i32
    %c0_i32_0 = arith.constant 0 : i32
    %c0_i32_1 = arith.constant 0 : i32
    return %arg0, %c0_i32, %c0_i32_0 : i32, i32, i32
  }
  func.func @transform_1(%arg0: i32) -> (i32, i32, i32) {
    %c0_i32 = arith.constant 0 : i32
    %c0_i32_0 = arith.constant 0 : i32
    %c0_i32_1 = arith.constant 0 : i32
    return %arg0, %c0_i32, %c0_i32_0 : i32, i32, i32
  }
  func.func @transform_2(%arg0: i32) -> (i32, i32, i32) {
    %c0_i32 = arith.constant 0 : i32
    %c0_i32_0 = arith.constant 0 : i32
    %c0_i32_1 = arith.constant 0 : i32
    return %arg0, %c0_i32, %c0_i32_0 : i32, i32, i32
  }
  func.func @transform_3(%arg0: i32) -> (i32, i32, i32) {
    %c0_i32 = arith.constant 0 : i32
    %c0_i32_0 = arith.constant 0 : i32
    %c0_i32_1 = arith.constant 0 : i32
    return %arg0, %c0_i32, %c0_i32_0 : i32, i32, i32
  }
  func.func @transform_4(%arg0: i32) -> (i32, i32, i32) {
    %c0_i32 = arith.constant 0 : i32
    %c0_i32_0 = arith.constant 0 : i32
    %c0_i32_1 = arith.constant 0 : i32
    return %arg0, %c0_i32, %c0_i32_0 : i32, i32, i32
  }
  func.func @transform_5(%arg0: i32) -> (i32, i32, i32) {
    %c0_i32 = arith.constant 0 : i32
    %c0_i32_0 = arith.constant 0 : i32
    %c0_i32_1 = arith.constant 0 : i32
    return %arg0, %c0_i32, %c0_i32_0 : i32, i32, i32
  }
  func.func @transform_6(%arg0: i32) -> (i32, i32, i32) {
    %c0_i32 = arith.constant 0 : i32
    %c0_i32_0 = arith.constant 0 : i32
    %c0_i32_1 = arith.constant 0 : i32
    return %arg0, %c0_i32, %c0_i32_0 : i32, i32, i32
  }
  func.func @transform_7(%arg0: i32) -> (i32, i32, i32) {
    %c0_i32 = arith.constant 0 : i32
    %c0_i32_0 = arith.constant 0 : i32
    %c0_i32_1 = arith.constant 0 : i32
    return %arg0, %c0_i32, %c0_i32_0 : i32, i32, i32
  }
  func.func @transform_8(%arg0: i32) -> (i32, i32) {
    %c0_i32 = arith.constant 0 : i32
    %c0_i32_0 = arith.constant 0 : i32
    %c0_i32_1 = arith.constant 0 : i32
    return %c0_i32, %c0_i32_0 : i32, i32
  }
  func.func @transform_9(%arg0: i32) -> (i32, i32) {
    %c0_i32 = arith.constant 0 : i32
    %c0_i32_0 = arith.constant 0 : i32
    %c0_i32_1 = arith.constant 0 : i32
    return %c0_i32, %c0_i32_0 : i32, i32
  }
  func.func @transform_10(%arg0: i32) -> (i32, i32, i32) {
    %c0_i32 = arith.constant 0 : i32
    %c0_i32_0 = arith.constant 0 : i32
    %c0_i32_1 = arith.constant 0 : i32
    %c0_i32_2 = arith.constant 0 : i32
    return %c0_i32, %c0_i32_0, %c0_i32_1 : i32, i32, i32
  }
  func.func @transform_11(%arg0: i32) -> (i32, i32, i32) {
    %c0_i32 = arith.constant 0 : i32
    %c0_i32_0 = arith.constant 0 : i32
    %c0_i32_1 = arith.constant 0 : i32
    %c0_i32_2 = arith.constant 0 : i32
    return %c0_i32, %c0_i32_0, %c0_i32_1 : i32, i32, i32
  }
  func.func @transform_12(%arg0: i32) -> (i32, i32, i32) {
    %c0_i32 = arith.constant 0 : i32
    %c0_i32_0 = arith.constant 0 : i32
    %c0_i32_1 = arith.constant 0 : i32
    %c0_i32_2 = arith.constant 0 : i32
    return %c0_i32, %c0_i32_0, %c0_i32_1 : i32, i32, i32
  }
  func.func @transform_13(%arg0: i32) -> (i32, i32, i32) {
    %c0_i32 = arith.constant 0 : i32
    %c0_i32_0 = arith.constant 0 : i32
    %c0_i32_1 = arith.constant 0 : i32
    %c0_i32_2 = arith.constant 0 : i32
    return %c0_i32, %c0_i32_0, %c0_i32_1 : i32, i32, i32
  }
  func.func @transform_14(%arg0: i32) -> (i32, i32, i32) {
    %c0_i32 = arith.constant 0 : i32
    %c0_i32_0 = arith.constant 0 : i32
    %c0_i32_1 = arith.constant 0 : i32
    %c0_i32_2 = arith.constant 0 : i32
    return %c0_i32, %c0_i32_0, %c0_i32_1 : i32, i32, i32
  }
  func.func @transform_15(%arg0: i32) -> (i32, i32, i32) {
    %c0_i32 = arith.constant 0 : i32
    %c0_i32_0 = arith.constant 0 : i32
    %c0_i32_1 = arith.constant 0 : i32
    %c0_i32_2 = arith.constant 0 : i32
    return %c0_i32, %c0_i32_0, %c0_i32_1 : i32, i32, i32
  }
  func.func @transform_16(%arg0: i32) -> (i32, i32) {
    %c0_i32 = arith.constant 0 : i32
    %c0_i32_0 = arith.constant 0 : i32
    %c0_i32_1 = arith.constant 0 : i32
    return %c0_i32, %c0_i32_0 : i32, i32
  }
  func.func @transform_17(%arg0: i32) -> (i32, i32) {
    %c0_i32 = arith.constant 0 : i32
    %c0_i32_0 = arith.constant 0 : i32
    %c0_i32_1 = arith.constant 0 : i32
    return %c0_i32, %c0_i32_0 : i32, i32
  }
  func.func @transform_18(%arg0: i32) -> (i32, i32) {
    %c0_i32 = arith.constant 0 : i32
    %c0_i32_0 = arith.constant 0 : i32
    %c0_i32_1 = arith.constant 0 : i32
    return %c0_i32, %c0_i32_0 : i32, i32
  }
  func.func @transform_19(%arg0: i32) -> (i32, i32) {
    %c0_i32 = arith.constant 0 : i32
    %c0_i32_0 = arith.constant 0 : i32
    %c0_i32_1 = arith.constant 0 : i32
    return %c0_i32, %c0_i32_0 : i32, i32
  }
  func.func @transform_20(%arg0: i32) -> (i32, i32) {
    %c0_i32 = arith.constant 0 : i32
    %c0_i32_0 = arith.constant 0 : i32
    %c0_i32_1 = arith.constant 0 : i32
    return %c0_i32, %c0_i32_0 : i32, i32
  }
  func.func @transform_21(%arg0: i32) -> (i32, i32, i32) {
    %c0_i32 = arith.constant 0 : i32
    %c0_i32_0 = arith.constant 0 : i32
    %c0_i32_1 = arith.constant 0 : i32
    return %arg0, %c0_i32, %c0_i32_0 : i32, i32, i32
  }
}

</mosaic_0001>

<bundles_post_ra>
// kernel: tpu_custom_call.1
= control target key start
LH: loop header
LB: loop body
LE: loop exit
PB: predicated region body
PF: predicated region fallthrough
CT: control target
= control target key end

     0   :  { %s3789_s0 = inlined_call_operand.vmem [shape: bf16[2,6,24], index: 0, kind: input, shape index: {}]   ;;  %s3790_s1 = inlined_call_operand.vmem [shape: f32[2,6,6], index: 1, kind: input, shape index: {}]   ;;  %s3791_s2 = inlined_call_operand.hbm [shape: f32[2,2,6], index: 2, kind: input, shape index: {}]   ;;  %s3792_s3 = inlined_call_operand.hbm [shape: f32[2,1,2], index: 3, kind: input, shape index: {}]   ;;  %s3793_s4 = inlined_call_operand.hbm [shape: f32[2,1,128], index: 4, kind: input, shape index: {}]   ;;  %s3794_s5 = inlined_call_operand.vmem [shape: bf16[2,24,32], index: 5, kind: input, shape index: {}]   ;;  %s3795_s6 = inlined_call_operand.hbm [shape: f32[2,1,32], index: 6, kind: input, shape index: {}]   ;;  %s3796_s7 = inlined_call_operand.vmem [shape: bf16[2,128,32], index: 7, kind: input, shape index: {}]   ;;  %s3797_s8 = inlined_call_operand.vmem [shape: bf16[32,32], index: 8, kind: input, shape index: {}]   ;;  %s3798_s9 = inlined_call_operand.vmem [shape: f32[1,32], index: 9, kind: input, shape index: {}]   ;;  %s3799_s10 = inlined_call_operand.vmem [shape: bf16[4,32,32], index: 10, kind: input, shape index: {}]   ;;  %s3800_s11 = inlined_call_operand.vmem [shape: f32[4,1,32], index: 11, kind: input, shape index: {}]   ;;  %s3801_s12 = inlined_call_operand.vmem [shape: bf16[4,32,32], index: 12, kind: input, shape index: {}]   ;;  %s3802_s13 = inlined_call_operand.vmem [shape: f32[4,1,32], index: 13, kind: input, shape index: {}]   ;;  %s3803_s14 = inlined_call_operand.vmem [shape: bf16[2,32,32], index: 14, kind: input, shape index: {}]   ;;  %s3804_s15 = inlined_call_operand.vmem [shape: f32[2,1,32], index: 15, kind: input, shape index: {}]   ;;  %s3805_s16 = inlined_call_operand.vmem [shape: f32[1,32], index: 16, kind: input, shape index: {}]   ;;  %s3806_s17 = inlined_call_operand.vmem [shape: f32[1,32], index: 17, kind: input, shape index: {}]   ;;  %s3807_s18 = inlined_call_operand.vmem [shape: f32[1,32], index: 18, kind: input, shape index: {}]   ;;  %s3808_s19 = inlined_call_operand.vmem [shape: bf16[1,32], index: 19, kind: input, shape index: {}]   ;;  %s3809_s20 = inlined_call_operand.<no memory space> [shape: f32[1,1], index: 20, kind: input, shape index: {}]   ;;  %s3810_s21 = inlined_call_operand.hbm [shape: f32[2,1,128], index: 21, kind: output, shape index: {}]  }
   0x1   :  { %3829 = sst [smem:[#allocation23_spill]] %s3789_s0  ;;  %v26_v0 = vstv %s3809_s20 }
   0x2   :  { %3830 = sst [smem:[#allocation24_spill]] %s3790_s1  ;;  %27 = vst [vmem:[#allocation2] sm:$0x1] %v26_v0 }
   0x3   :  { %3831 = sst [smem:[#allocation25_spill]] %s3791_s2 }
   0x4   :  { %3832 = sst [smem:[#allocation26_spill]] %s3792_s3 }
   0x5   :  { %3833 = sst [smem:[#allocation27_spill]] %s3793_s4 }
   0x6   :  { %3834 = sst [smem:[#allocation28_spill]] %s3794_s5 }
   0x7   :  { %3835 = sst [smem:[#allocation29_spill]] %s3804_s15 }
   0x8   :  { %3836 = sst [smem:[#allocation30_spill]] %s3805_s16 }
   0x9   :  { %3837 = sst [smem:[#allocation31_spill]] %s3806_s17 }
   0xa   :  { %3838 = sst [smem:[#allocation32_spill]] %s3807_s18 }
   0xb   :  { %3839 = sst [smem:[#allocation33_spill]] %s3808_s19 }
   0xc   :  { %3840 = sst [smem:[#allocation34_spill]] %s3810_s21 }
   0xd   :  { %28 = vsyncpa [#allocation4], 0 }
   0xe   :  { %30 = vsyncpa [#allocation4 + $0x1], 0 }
   0xf   :  { %31 = vsyncpa [#allocation7], 0 }
  0x10   :  { %33 = vsyncpa [#allocation7 + $0x1], 0 }
  0x11   :  { %34 = vsyncpa [#allocation10], 0 }
  0x12   :  { %36 = vsyncpa [#allocation10 + $0x1], 0 }
  0x13   :  { %37 = vsyncpa [#allocation5], 0 }
  0x14   :  { %39 = vsyncpa [#allocation5 + $0x1], 0  ;;  %s3247_s26 = smov 0   ;;  %s3249_s27 = smov 0  }
  0x15   :  { %s3251_s3 = smov 0   ;;  %s3253_s28 = smov 0  }
  0x16 LB: > { %3841 = sst [smem:[#allocation16_spill]] %s3112_s26  ;;  %s3268_s20 = sadd.s32 4294967295, %s3124_s28   ;;  %s3124_s28 = sphi %s3253_s28, %s3881_s28   ;;  %s3120_s3 = sphi %s3251_s3, %s3883_s3   ;;  %s3116_s27 = sphi %s3249_s27, %s3885_s27   ;;  %s3112_s26 = sphi %s3247_s26, %s3884_s26  }
  0x17   : > { %3842 = sst [smem:[#allocation17_spill]] %s3120_s3  ;;  %s2479_s29 = sadd.s32 4294967294, %s3124_s28  }
  0x18   : > { %3843 = sst [smem:[#allocation18_spill]] %s3124_s28  ;;  %s3272_s0 = sadd.s32 1, %s3124_s28  }
  0x19   : > { %3844 = sst [smem:[#allocation19_spill]] %s3272_s0  ;;  %s104_s4 = sadd.s32 1, %s3120_s3 }
  0x1a   : > { %s101_s30 = ssub.s32 %s3124_s28, %s3272_s0  ;;  %p111_p0 = scmp.ne.s32.totalorder %s3120_s3, %s3116_s27 }
  0x1b   : > { %p102_p1 = scmp.eq.s32.totalorder %s101_s30, 0  ;;  %p112_p2 = scmp.eq.s32.totalorder %s3124_s28, 0 }
  0x1c   : > { %p117_p3 = scmp.ne.s32.totalorder %s3116_s27, %s3112_s26  ;;  %p118_p4 = scmp.eq.s32.totalorder %s3268_s20, 0 }
  0x1d   : > { %s3284_s5 = scalar_select %p102_p1, %s3120_s3, %s104_s4  }
  0x1e   : > { %p113_p5 = por %p112_p2, %p111_p0  ;;  %p3286_p6 = por %p118_p4, %p117_p3 }
  0x1f   : > { %3845 = sst [smem:[#allocation20_spill]] %s3284_s5  ;;  %p544_p7 = scmp.eq.s32.totalorder %s3268_s20, 1 }
  0x20   : > { %s3846_s22 = scalar_select %p3286_p6, 1, 0 }
  0x21   : > { %p550_p8 = scmp.eq.s32.totalorder %s2479_s29, 1  ;;  %p2847_p10 = scmp.lt.s32.totalorder %s3124_s28, 2 }
  0x22   : > { %p3293_p11 = por %p544_p7, %p111_p0  ;;  %s3302_s24 = sand.u32 1, %s3120_s3  }
  0x23   : > { %p3297_p12 = por %p550_p8, %p117_p3  ;;  %p3304_p13 = pnand %p2847_p10, %p113_p5 }
  0x24   : > { %s3847_s23 = scalar_select %p3293_p11, 1, 0 }
  0x25   : > { %s3849_s1 = scalar_select %p3297_p12, 1, 0 }
  0x26   : > { %3848 = sst [smem:[#allocation21_spill]] %s3847_s23  ;;  %s641_s25 = sand.u32 1, %s3124_s28  }
  0x27   : > { %3850 = sst [smem:[#allocation22_spill]] %s3849_s1  ;;  %s3310_s29 = sshll.u32 %s3124_s28, 4 }
  0x28   : > { %s3851_s2 = scalar_select %p3304_p13, 1, 0 }
  0x29   : > { %s644_s4 = scalar_lea.vmem [#allocation6], %s3302_s24  ;;  %s3852_s26 = sld [smem:[#allocation26_spill]] }
  0x2a   : > { %s651_s30 = sshll.u32 %s644_s4, 4  ;;  %s3321_s3 = scalar_lea.sflag [#allocation7], %s641_s25  ;;  %s3319_s30 = int_to_ptr.vmem [resolvable:$true] %s651_s30 }
  0x2b   : > { %p3327_p1 = pneg %p3304_p13 }
  0x2f   : > { %s3853_s21 = smov %s3852_s26  ;;  %s3317_s23 = scalar_lea.hbm %s3852_s26, %s3310_s29 }
  0x30   : > { %s2930_s1 = scalar_lea.hbm %s3317_s23, 16  ;;  %s2935_s5 = scalar_lea.hbm %s3853_s21, 32 }
  0x31   : > { %p2931_p0 = scmp.ne.s32.totalorder %s3317_s23, %s2930_s1  ;;  %p2936_p4 = scmp.lt.u32.totalorder %s3317_s23, %s3853_s21 }
  0x32   : > { %p2937_p5 = scmp.lt.u32.totalorder %s2935_s5, %s2930_s1  ;;  %p2939_p8 = scmp.lt.u32.totalorder %s2930_s1, %s3317_s23 }
  0x33   : > { %p2933_p2 = pnand %p3327_p1, %p2931_p0 }
  0x34   : > { %p2938_p7 = por %p2937_p5, %p2936_p4 }
  0x35   : > { %p2934_p3 = pneg %p2933_p2 }
  0x36   : > { %p2940_p10 = por %p2939_p8, %p2938_p7 }
  0x38   : > { %p2941_p9 = pnand %p2940_p10, %p2934_p3 }
  0x3a   : > { %2944 = shalt.err (!%p2941_p9)
}
  0x3b   : > { %s2945_s25 = scalar_lea.vmem %s3319_s30, 16  ;;  %s3126_s26 = smov [#allocation6]  }
  0x3c   : > { %p2946_p0 = scmp.ne.s32.totalorder %s3319_s30, %s2945_s25  ;;  %s2950_s0 = sshll.u32 %s3126_s26, 4  ;;  %s2951_s0 = int_to_ptr.vmem [resolvable:$false] %s2950_s0 }
  0x3d   : > { %s2952_s19 = scalar_lea.vmem %s2951_s0, 32  ;;  %p2953_p11 = scmp.lt.s32.totalorder %s3319_s30, %s2951_s0 }
  0x3e   : > { %p2948_p2 = pnand %p2946_p0, %p3327_p1  ;;  %p2954_p6 = scmp.lt.s32.totalorder %s2952_s19, %s2945_s25 }
  0x40   : > { %p2949_p12 = pneg %p2948_p2  ;;  %p2955_p4 = por %p2954_p6, %p2953_p11 }
  0x42   : > { %p2956_p5 = pnand %p2955_p4, %p2949_p12 }
  0x44   : > { %2959 = shalt.err (!%p2956_p5)
}
  0x45   : > { %2836 = dma.hbm_to_vmem [thread:$0]  (!%p3304_p13), %s3317_s23, 16, %s3319_s30, %s3321_s3  }
  0x46   : > { %p2487_p9 = scmp.ge.s32.totalorder %s3124_s28, 1  ;;  %p706_p3 = scmp.lt.s32.totalorder %s3124_s28, 3 }
  0x47   : > { %s2482_s1 = sshll.u32 %s3302_s24, 1  ;;  %s2483_s4 = sshll.u32 %s3124_s28, 5 }
  0x48   : > { %p3354_p7 = pnand %p2487_p9, %p706_p3  ;;  %s627_s25 = scalar_lea.vmem [#allocation3], %s2482_s1 }
  0x49   : > { %s634_s26 = sshll.u32 %s627_s25, 4  ;;  %s3856_s21 = sld [smem:[#allocation25_spill]]  ;;  %s635_s26 = int_to_ptr.vmem [resolvable:$true] %s634_s26 }
  0x4a   : > { %s3855_s5 = scalar_select %p3354_p7, 1, 0 }
  0x4b   : > { %s624_s23 = scalar_lea.sflag [#allocation4], %s3302_s24 }
  0x4f   : > { %s3362_s17 = scalar_lea.hbm %s3856_s21, %s2483_s4  ;;  %s2965_s1 = scalar_lea.hbm %s3856_s21, 64 }
  0x50   : > { %s2960_s30 = scalar_lea.hbm %s3362_s17, 32  ;;  %p2966_p8 = scmp.lt.u32.totalorder %s3362_s17, %s3856_s21 }
  0x51   : > { %p2961_p6 = scmp.ne.s32.totalorder %s3362_s17, %s2960_s30  ;;  %p2967_p10 = scmp.lt.u32.totalorder %s2965_s1, %s2960_s30 }
  0x52   : > { %p2969_p2 = scmp.lt.u32.totalorder %s2960_s30, %s3362_s17 }
  0x53   : > { %p2963_p11 = pnand %p2961_p6, %p3327_p1  ;;  %p2968_p0 = por %p2967_p10, %p2966_p8 }
  0x55   : > { %p2964_p12 = pneg %p2963_p11  ;;  %p2970_p4 = por %p2969_p2, %p2968_p0 }
  0x57   : > { %p2971_p5 = pnand %p2970_p4, %p2964_p12 }
  0x59   : > { %2974 = shalt.err (!%p2971_p5)
}
  0x5a   : > { %s2975_s4 = scalar_lea.vmem %s635_s26, 32  ;;  %s3127_s0 = smov [#allocation3]  }
  0x5b   : > { %p2976_p9 = scmp.ne.s32.totalorder %s635_s26, %s2975_s4  ;;  %s2980_s19 = sshll.u32 %s3127_s0, 4  ;;  %s2981_s19 = int_to_ptr.vmem [resolvable:$false] %s2980_s19 }
  0x5c   : > { %s2982_s16 = scalar_lea.vmem %s2981_s19, 64  ;;  %p2983_p11 = scmp.lt.s32.totalorder %s635_s26, %s2981_s19 }
  0x5d   : > { %p2978_p3 = pnand %p2976_p9, %p3327_p1  ;;  %p2984_p7 = scmp.lt.s32.totalorder %s2982_s16, %s2975_s4 }
  0x5f   : > { %p2979_p6 = pneg %p2978_p3  ;;  %p2985_p13 = por %p2984_p7, %p2983_p11 }
  0x61   : > { %p2986_p8 = pnand %p2985_p13, %p2979_p6 }
  0x63   : > { %2989 = shalt.err (!%p2986_p8)
}
  0x64   : > { %p3857_p10 = scmp.ne.s32.totalorder %s3851_s2, 0  ;;  %s3858_s30 = sld [smem:[#allocation27_spill]] }
  0x65   : > { %s661_s25 = scalar_lea.vmem [#allocation8], %s3302_s24 }
  0x66   : > { %2833 = dma.hbm_to_vmem [thread:$0]  (!%p3857_p10), %s3362_s17, 32, %s635_s26, %s624_s23  }
  0x67   : > { %s668_s4 = sshll.u32 %s661_s25, 4  ;;  %s669_s4 = int_to_ptr.vmem [resolvable:$true] %s668_s4 }
  0x6a   : > { %s3386_s1 = scalar_lea.hbm %s3858_s30, %s3310_s29  ;;  %s2995_s17 = scalar_lea.hbm %s3858_s30, 32 }
  0x6b   : > { %s2990_s0 = scalar_lea.hbm %s3386_s1, 16  ;;  %p2996_p0 = scmp.lt.u32.totalorder %s3386_s1, %s3858_s30 }
  0x6c   : > { %p2991_p13 = scmp.ne.s32.totalorder %s3386_s1, %s2990_s0  ;;  %p2997_p2 = scmp.lt.u32.totalorder %s2995_s17, %s2990_s0 }
  0x6d   : > { %p2999_p5 = scmp.lt.u32.totalorder %s2990_s0, %s3386_s1 }
  0x6e   : > { %p2993_p7 = pnand %p2991_p13, %p3327_p1  ;;  %p2998_p4 = por %p2997_p2, %p2996_p0 }
  0x70   : > { %p2994_p12 = pneg %p2993_p7  ;;  %p3000_p9 = por %p2999_p5, %p2998_p4 }
  0x72   : > { %p3001_p3 = pnand %p3000_p9, %p2994_p12 }
  0x74   : > { %3004 = shalt.err (!%p3001_p3)
}
  0x75   : > { %s3005_s15 = scalar_lea.vmem %s669_s4, 16  ;;  %s3128_s28 = smov [#allocation8]  }
  0x76   : > { %p3006_p6 = scmp.ne.s32.totalorder %s669_s4, %s3005_s15  ;;  %s3010_s25 = sshll.u32 %s3128_s28, 4  ;;  %s3011_s25 = int_to_ptr.vmem [resolvable:$false] %s3010_s25 }
  0x77   : > { %s3012_s19 = scalar_lea.vmem %s3011_s25, 32  ;;  %p3013_p13 = scmp.lt.s32.totalorder %s669_s4, %s3011_s25 }
  0x78   : > { %p3008_p11 = pnand %p3006_p6, %p3327_p1  ;;  %p3014_p7 = scmp.lt.s32.totalorder %s3012_s19, %s3005_s15 }
  0x7a   : > { %p3009_p8 = pneg %p3008_p11  ;;  %p3015_p10 = por %p3014_p7, %p3013_p13 }
  0x7c   : > { %p3016_p0 = pnand %p3015_p10, %p3009_p8 }
  0x7e   : > { %3019 = shalt.err (!%p3016_p0)
}
  0x7f   : > { %p3859_p2 = scmp.ne.s32.totalorder %s3851_s2, 0  ;;  %s3411_s17 = scalar_lea.hbm %s3795_s6, %s3310_s29 }
  0x80   : > { %s686_s26 = scalar_lea.vmem [#allocation9], %s3302_s24  ;;  %s684_s15 = scalar_lea.sflag [#allocation10], %s3302_s24 }
  0x81   : > { %2839 = dma.hbm_to_vmem [thread:$0]  (!%p3859_p2), %s3386_s1, 16, %s669_s4, %s3321_s3  }
  0x82   : > { %s693_s23 = sshll.u32 %s686_s26, 4  ;;  %s3020_s28 = scalar_lea.hbm %s3411_s17, 16  ;;  %s694_s23 = int_to_ptr.vmem [resolvable:$true] %s693_s23 }
  0x83   : > { %p3021_p10 = scmp.ne.s32.totalorder %s3411_s17, %s3020_s28  ;;  %s3025_s1 = scalar_lea.hbm %s3795_s6, 32 }
  0x84   : > { %p3026_p5 = scmp.lt.u32.totalorder %s3411_s17, %s3795_s6  ;;  %p3027_p9 = scmp.lt.u32.totalorder %s3025_s1, %s3020_s28 }
  0x85   : > { %p3023_p12 = pnand %p3021_p10, %p3327_p1  ;;  %p3029_p6 = scmp.lt.u32.totalorder %s3020_s28, %s3411_s17 }
  0x86   : > { %p3028_p3 = por %p3027_p9, %p3026_p5 }
  0x87   : > { %p3024_p4 = pneg %p3023_p12 }
  0x88   : > { %p3030_p11 = por %p3029_p6, %p3028_p3 }
  0x8a   : > { %p3031_p8 = pnand %p3030_p11, %p3024_p4 }
  0x8c   : > { %3034 = shalt.err (!%p3031_p8)
}
  0x8d   : > { %s3035_s24 = scalar_lea.vmem %s694_s23, 16  ;;  %s3129_s19 = smov [#allocation9]  }
  0x8e   : > { %p3036_p13 = scmp.ne.s32.totalorder %s694_s23, %s3035_s24  ;;  %s3040_s0 = sshll.u32 %s3129_s19, 4  ;;  %s3041_s0 = int_to_ptr.vmem [resolvable:$false] %s3040_s0 }
  0x8f   : > { %s3042_s16 = scalar_lea.vmem %s3041_s0, 32  ;;  %p3043_p10 = scmp.lt.s32.totalorder %s694_s23, %s3041_s0 }
  0x90   : > { %p3038_p7 = pnand %p3036_p13, %p3327_p1  ;;  %p3044_p12 = scmp.lt.s32.totalorder %s3042_s16, %s3035_s24 }
  0x92   : > { %p3039_p0 = pneg %p3038_p7  ;;  %p3045_p2 = por %p3044_p12, %p3043_p10 }
  0x94   : > { %p3046_p5 = pnand %p3045_p2, %p3039_p0 }
  0x96   : > { %3049 = shalt.err (!%p3046_p5)
}
  0x97   : > { %p3860_p9 = scmp.ne.s32.totalorder %s3851_s2, 0  ;;  %p3861_p4 = scmp.ne.s32.totalorder %s3855_s5, 0 }
  0x98   : > { %s3435_s18 = sand.u32 (!%p3861_p4), 1, %s3116_s27   ;;  %p3862_p1 = scmp.ne.s32.totalorder (!%p3861_p4), %s3846_s22, 0 }
  0x99   : > { %2842 = dma.hbm_to_vmem [thread:$0]  (!%p3860_p9), %s3411_s17, 16, %s694_s23, %s684_s15  }
  0x9a   : > { %710 = sbr.rel (%p3861_p4) target bundleno = 4307 (0x10d3), region = 104  ;;  %s2488_s26 = sshll.u32 (!%p3861_p4), %s3435_s18, 1 }
  0x9b   : > { %s713_s28 = scalar_lea.sflag (!%p3861_p4), [#allocation4], %s3435_s18  ;;  %s3439_s25 = scalar_lea.vmem (!%p3861_p4), [#allocation3], %s2488_s26 }
  0xa1   : > { %3095 = dma.done.wait (%p3862_p1), %s713_s28, 32  }
  0xa2   : > { %3097 = vsyncadd (%p3862_p1), %s713_s28, 4294967264  ;;  %s721_s2 = sand.u32 1, %s3268_s20   ;;  %s724_s17 = scalar_lea.vmem [#allocation6], %s3435_s18 }
  0xa3   : > { %s722_s5 = scalar_lea.sflag [#allocation7], %s721_s2 }
  0xa4   : > { %3099 = dma.done.wait (%p3862_p1), %s722_s5, 32  }
  0xa5   : > { %3101 = vsyncadd (%p3862_p1), %s722_s5, 4294967264  ;;  %s738_s15 = scalar_lea.sflag [#allocation10], %s3435_s18  ;;  %s740_s3 = scalar_lea.vmem [#allocation9], %s3435_s18 }
  0xa6   : > { %3103 = dma.done.wait (%p3862_p1), %s738_s15, 16  }
  0xa7   : > { %3105 = vsyncadd (%p3862_p1), %s738_s15, 4294967280  ;;  %p828_p2 = scmp.lt.s32.totalorder %s3268_s20, 1  ;;  %v3130_v1 = vmov 0.0   ;;  %vm3131_vm0 = vmmov 0   ;;  %s3863_s19 = sld [smem:[#allocation28_spill]]  ;;  %vm864_vm1 = vcmask 1043456  }
  0xa8   : > { %2658 = vmatprep.subr.bf16.mxu0 %v3130_v1  ;;  %2662 = vmatprep.mubr.msk.bf16.mxu0 %vm3131_vm0, %v3130_v1  ;;  %s3864_s28 = sld [smem:[#allocation23_spill]]  ;;  %vm860_vm2 = vcmask 195584   ;;  %v2888_v6 = vld [vmem:[%s3797_s8] sm:$0xff]   ;;  %v2889_v7 = vld [vmem:[%s3797_s8 + $0x8] sm:$0xff]   ;;  %vm932_vm3 = vcmask 261120   ;;  %v2892_v20 = vld [vmem:[%s3799_s10 + $0x10] sm:$0xff]  }
  0xa9   : > { %s3463_s1 = scalar_select %p828_p2, %s3268_s20, 1  ;;  %2718 = vmatprep.subr.mxu1 %v3130_v1  ;;  %2720 = vmatprep.mubr.msk.f32.mxu1 %vm3131_vm0, %v3130_v1  ;;  %v2890_v9 = vld [vmem:[%s3799_s10] sm:$0xff]   ;;  %v2891_v14 = vld [vmem:[%s3799_s10 + $0x8] sm:$0xff]   ;;  %v2893_v23 = vld [vmem:[%s3799_s10 + $0x18] sm:$0xff]   ;;  %vm1243_vm4 = vcmask 1042432   ;;  %vm1225_vm6 = vcmask 46080  }
  0xaa   : > { %v2497_v15 = vld [vmem:[%s3798_s9] ss:$0 sm:$0xff]  ;;  %v2895_v25 = vld [vmem:[%s3799_s10 + $0x28] sm:$0xff]   ;;  %v2510_v30 = vld [vmem:[%s3800_s11 + $0x1] ss:$0 sm:$0xff]  ;;  %vm1239_vm7 = vcmask 48128  }
  0xab   : > { %s2813_s22 = smul.u32 12, %s3463_s1  ;;  %s2489_s4 = sshll.u32 %s3463_s1, 2  ;;  %v2894_v24 = vld [vmem:[%s3799_s10 + $0x20] sm:$0xff]   ;;  %vm1360_vm8 = vcmask 1045504   ;;  %vm1707_vm9 = vcmask 1040384   ;;  %vm1689_vm12 = vcmask 9216  }
  0xac   : > { %s2598_s5 = sshll.u32 %s3463_s1, 6  ;;  %v2501_v31 = vld [vmem:[%s3800_s11] ss:$0 sm:$0xff]  ;;  %v2519_v40 = vld [vmem:[%s3800_s11 + $0x2] ss:$0 sm:$0xff]  ;;  %vm1703_vm13 = vcmask 15360  }
  0xad   : > { %s840_s0 = scalar_lea.vmem %s3863_s19, %s2813_s22  ;;  %s3488_s29 = scalar_lea.vmem %s3796_s7, %s2598_s5  ;;  %vm1823_vm14 = vcmask 1041408   ;;  %vm2105_vm15 = vcmask 253952  }
  0xae   : > { %v2886_v2 = vld [vmem:[%s840_s0] sm:$0xff]   ;;  %v2887_v3 = vld [vmem:[%s840_s0 + $0x8] ss:$0 sps:$4 sm:$0xff]   ;;  %s831_s2 = scalar_lea.vmem %s3864_s28, %s2489_s4  ;;  %s2490_s22 = sshll.u32 %s3463_s1, 3 }
  0xaf   : > { %2659 = vmatpush3.bf16.msra.mxu0 %v2886_v2  ;;  %v866_v4 = vsel %vm864_vm1, %v2887_v3, 0  ;;  %v847_v5 = vld [vmem:[%s831_s2] sm:$0x7]  ;;  %s3865_s19 = sld [smem:[#allocation24_spill]]  ;;  %v2896_v2 = vld [vmem:[%s3799_s10 + $0x30] sm:$0xff]   ;;  %s3866_s24 = sld [smem:[#allocation29_spill]] }
  0xb0   : > { %2660 = vmatprep.subr.bf16.mxu0 %v3130_v1  ;;  %s3868_s16 = sld [smem:[#allocation31_spill]]  ;;  %s3869_s5 = sld [smem:[#allocation33_spill]] }
  0xb1   : > { %s3870_s4 = sld [smem:[#allocation32_spill]]  ;;  %s2595_s1 = sshll.u32 %s3268_s20, 4 }
  0xb2   : > { %s827_s0 = scalar_lea.vmem [#allocation11], %s3435_s18  ;;  %s3873_s28 = sld [smem:[#allocation34_spill]] }
  0xb3   : > { %2661 = vmatpush3.bf16.msra.mxu0 %v866_v4  ;;  %v2897_v4 = vld [vmem:[%s3799_s10 + $0x38] sm:$0xff]   ;;  %s2296_s15 = scalar_lea.sflag [#allocation5], %s3435_s18  ;;  %s3133_s20 = smov [#allocation11]  }
  0xb4   : > { %2666 = vmatprep.subr.bf16.mxu0 %v3130_v1 }
  0xb5   : > { %s835_s23 = scalar_lea.vmem %s3865_s19, %s2490_s22 }
  0xb6   : > { %2663 = vmatmul.mubr.msk.bf16.vlgmr.msra.gmra.mrb[0].mxu0 %vm860_vm2, %v847_v5  ;;  %v1222_v50 = vld [vmem:[%s835_s23] sm:$0x3f]  ;;  %s3867_s23 = sld [smem:[#allocation30_spill]] }
  0xb7   : > { %2667 = vmatpush3.bf16.msra.mxu0 %v2888_v6  ;;  %2670 = vmatprep.mubr.msk.bf16.mxu0 %vm3131_vm0, %v3130_v1  ;;  %vm1223_vm5 = vcmp.gt.f32.partialorder %v1222_v50, 0.0  ;;  %v3132_v50 = vmov 0  }
  0xb8   : > { %2668 = vmatprep.subr.bf16.mxu0 %v3130_v1  ;;  %2884 = vset.pattern.permute.xlu1 %v3132_v50  ;;  %s3874_s2 = smov %s3873_s28 }
  0xb9   : > { %2885 = vset.pattern.permute.xlu0 %v3132_v50 }
  0xbb   : > { %2669 = vmatpush3.bf16.msra.mxu0 %v2889_v7 }
  0xbc   : > { %2674 = vmatprep.subr.bf16.mxu0 %v3130_v1 }
 0x189   : > { %v902_v8 = vpop.f32.mrb[0].mxu0 }
 0x18a   : > { %v908_v10 = vpack.c.bf16 %v902_v8, %v902_v8  ;;  %v2664_v11 = vpop.f32.mrb[1].mxu0 }
 0x18b   : > { %v905_v12 = vpop.f32.mrb[2].mxu0  ;;  %v2530_v11 = vld [vmem:[%s3800_s11 + $0x3] ss:$0 sm:$0xff] }
 0x18c   : > { %v2665_v13 = vpop.f32.mrb[3].mxu0  ;;  %2671 = vmatmul.mubr.msk.bf16.vlgmr.msra.gmra.mrb[4].mxu0 %vm932_vm3, %v908_v10  ;;  %v2899_v10 = vld [vmem:[%s3801_s12 + $0x10] sm:$0xff]  }
 0x18d   : > { %2675 = vmatpush3.bf16.msra.mxu0 %v2890_v9  ;;  %2678 = vmatprep.mubr.msk.bf16.mxu0 %vm3131_vm0, %v3130_v1 }
 0x18e   : > { %2676 = vmatprep.subr.bf16.mxu0 %v3130_v1 }
 0x191   : > { %2677 = vmatpush3.bf16.msra.mxu0 %v2891_v14 }
 0x192   : > { %2682 = vmatprep.subr.bf16.mxu0 %v3130_v1 }
 0x25f   : > { %v970_v16 = vpop.f32.mrb[4].mxu0 }
 0x260   : > { %v971_v17 = vadd.f32 %v2497_v15, %v970_v16  ;;  %v2672_v18 = vpop.f32.mrb[5].mxu0  ;;  %v1356_v15 = vld [vmem:[%s3439_s25] sm:$0x3]  ;;  %s3871_s25 = scalar_lea.vmem [#allocation8], %s3435_s18 }
 0x261   : > { %v973_v19 = vpop.f32.mrb[6].mxu0  ;;  %v2898_v16 = vld [vmem:[%s3801_s12] sm:$0xff]  }
 0x262   : > { %v976_v21 = vpack.c.bf16 %v971_v17, %v971_v17  ;;  %v2673_v22 = vpop.f32.mrb[7].mxu0  ;;  %v2900_v19 = vld [vmem:[%s3801_s12 + $0x8] sm:$0xff]  }
 0x263   : > { %v2902_v22 = vld [vmem:[%s3801_s12 + $0x20] sm:$0xff]  }
 0x264   : > { %2679 = vmatmul.mubr.msk.bf16.vlgmr.msra.gmra.mrb[8].mxu0 %vm932_vm3, %v976_v21 }
 0x265   : > { %2683 = vmatpush3.bf16.msra.mxu0 %v2892_v20  ;;  %2686 = vmatprep.mubr.msk.bf16.mxu0 %vm3131_vm0, %v3130_v1  ;;  %v2901_v20 = vld [vmem:[%s3801_s12 + $0x18] sm:$0xff]  }
 0x266   : > { %2684 = vmatprep.subr.bf16.mxu0 %v3130_v1 }
 0x269   : > { %2685 = vmatpush3.bf16.msra.mxu0 %v2893_v23 }
 0x26a   : > { %2690 = vmatprep.subr.bf16.mxu0 %v3130_v1 }
 0x26c   : > { %2687 = vmatmul.mubr.msk.bf16.vlgmr.msra.gmra.mrb[12].mxu0 %vm932_vm3, %v976_v21 }
 0x26d   : > { %2691 = vmatpush3.bf16.msra.mxu0 %v2894_v24  ;;  %2694 = vmatprep.mubr.msk.bf16.mxu0 %vm3131_vm0, %v3130_v1 }
 0x26e   : > { %2692 = vmatprep.subr.bf16.mxu0 %v3130_v1 }
 0x271   : > { %2693 = vmatpush3.bf16.msra.mxu0 %v2895_v25  ;;  %v2903_v25 = vld [vmem:[%s3801_s12 + $0x28] sm:$0xff]  }
 0x272   : > { %2698 = vmatprep.subr.bf16.mxu0 %v3130_v1 }
 0x274   : > { %2695 = vmatmul.mubr.msk.bf16.vlgmr.msra.gmra.mrb[16].mxu0 %vm932_vm3, %v976_v21 }
 0x275   : > { %2700 = vmatprep.mubr.msk.bf16.mxu0 %vm3131_vm0, %v3130_v1 }
 0x337   : > { %v1037_v26 = vpop.f32.mrb[8].mxu0 }
 0x338   : > { %v2680_v27 = vpop.f32.mrb[9].mxu0  ;;  %v1038_v36 = vadd.f32 %v2501_v31, %v1037_v26  ;;  %v2545_v26 = vld [vmem:[%s3802_s13 + $0x1] ss:$0 sm:$0xff] }
 0x339   : > { %v1040_v28 = vpop.f32.mrb[10].mxu0  ;;  %v2536_v27 = vld [vmem:[%s3802_s13] ss:$0 sm:$0xff] }
 0x33a   : > { %v2681_v29 = vpop.f32.mrb[11].mxu0  ;;  %v1173_v41 = vmul.f32 0.17677669, %v1038_v36 }
 0x33c   : > { %v1174_v46 = vpack.c.bf16 %v1173_v41, %v1173_v41 }
 0x33f   : > { %v1102_v32 = vpop.f32.mrb[12].mxu0 }
 0x340   : > { %v1103_v33 = vadd.f32 %v2510_v30, %v1102_v32  ;;  %v2688_v34 = vpop.f32.mrb[13].mxu0 }
 0x341   : > { %v1105_v35 = vpop.f32.mrb[14].mxu0 }
 0x342   : > { %v1175_v37 = vpack.c.bf16 %v1103_v33, %v1103_v33  ;;  %v2689_v38 = vpop.f32.mrb[15].mxu0 }
 0x344   : > { %v1180_v39 = vsel %vm932_vm3, %v1175_v37, 0 }
 0x345   : > { %2699 = vmatpush3.bf16.xpose.msra.mxu0 %v1180_v39 }
 0x346   : > { %2704 = vmatprep.subr.bf16.mxu0 %v3130_v1 }
 0x347   : > { %v1167_v42 = vpop.f32.mrb[16].mxu0 }
 0x348   : > { %v1168_v43 = vadd.f32 %v2519_v40, %v1167_v42  ;;  %v2696_v44 = vpop.f32.mrb[17].mxu0  ;;  %v2554_v40 = vld [vmem:[%s3802_s13 + $0x2] ss:$0 sm:$0xff] }
 0x349   : > { %v1170_v45 = vpop.f32.mrb[18].mxu0 }
 0x34a   : > { %v1238_v47 = vpack.c.bf16 %v1168_v43, %v1168_v43  ;;  %v2697_v48 = vpop.f32.mrb[19].mxu0 }
 0x34c   : > { %v1245_v49 = vsel %vm1243_vm4, %v1238_v47, 0  ;;  %2701 = vmatmul.mubr.msk.bf16.vlgmr.msra.gmra.mrb[20].mxu0 %vm932_vm3, %v1174_v46 }
 0x34d   : > { %2705 = vmatpush3.bf16.msra.mxu0 %v1245_v49  ;;  %2706 = vmatprep.mubr.msk.bf16.mxu0 %vm3131_vm0, %v3130_v1 }
 0x34e   : > { %2710 = vmatprep.subr.bf16.mxu0 %v3130_v1 }
 0x41f   : > { %v1216_v51 = vpop.f32.mrb[20].mxu0 }
 0x420   : > { %v1224_v52 = vsel %vm1223_vm5, %v1216_v51, -1e+30  ;;  %v2702_v53 = vpop.f32.mrb[21].mxu0  ;;  %v1683_v51 = vlaneseq }
 0x421   : > { %v1219_v54 = vpop.f32.mrb[22].mxu0  ;;  %v1226_v55 = vsel %vm1225_vm6, %v1224_v52, -inf }
 0x422   : > { %1227 = vmax.xlane.f32.xlu0 %v1226_v55  ;;  %v2703_v56 = vpop.f32.mrb[23].mxu0  ;;  %v3632_v53 = vshrl.u32 %v1683_v51, 7 }
 0x424   : > { %v1685_v54 = vsub.s32 0, %v3632_v53 }
 0x4af   : > { %v1228_v57 = vpop.xlane.xlu0 %1227 }
 0x4b0   : > { %v1229_v58 = vsub.f32 %v1224_v52, %v1228_v57  ;;  %v3630_v52 = vld [vmem:[%s724_s17] sm:$0x1] }
 0x4b1   : > { %vm1435_vm10 = vcmp.gt.f32.partialorder %v3630_v52, 0.0 }
 0x4b2   : > { %v1230_v59 = vmul.f32 1.442695, %v1229_v58  ;;  %v1682_v55 = vsel %vm1435_vm10, 1, %v3132_v50 }
 0x4b3   : > { %v1686_v56 = vrot.slane %v1682_v55, %v1685_v54 }
 0x4b4   : > { %2918 = vpow2.f32 %v1230_v59 }
 0x4b5   : > { %vm1687_vm11 = vcmp.eq.s32.totalorder %v1686_v56, 1 }
 0x4be   : > { %v2919_v60 = vpop.eup %2918 }
 0x4bf   : > { %v1232_v61 = vsel %vm1225_vm6, %v2919_v60, 0.0 }
 0x4c0   : > { %1233 = vadd.xlane.f32.xlu0 %v1232_v61 }
 0x54d   : > { %v1234_v62 = vpop.xlane.xlu0 %1233 }
 0x54e   : > { %2920 = vrcp.f32 %v1234_v62 }
 0x558   : > { %v2921_v63 = vpop.eup %2920 }
 0x559   : > { %v1236_v0 = vmul.f32 %v2921_v63, %v2919_v60 }
 0x55b   : > { %v1237_v3 = vpack.c.bf16 %v1236_v0, %v1236_v0 }
 0x55d   : > { %2707 = vmatmul.mubr.msk.bf16.vlgmr.msra.gmra.mrb[24].mxu0 %vm1239_vm7, %v1237_v3 }
 0x55e   : > { %2711 = vmatpush3.bf16.msra.mxu0 %v2896_v2  ;;  %2714 = vmatprep.mubr.msk.bf16.mxu0 %vm3131_vm0, %v3130_v1 }
 0x55f   : > { %2712 = vmatprep.subr.bf16.mxu0 %v3130_v1 }
 0x562   : > { %2713 = vmatpush3.bf16.msra.mxu0 %v2897_v4 }
 0x563   : > { %2731 = vmatprep.subr.bf16.mxu0 %v3130_v1 }
 0x630   : > { %v1281_v5 = vpop.f32.mrb[24].mxu0 }
 0x631   : > { %v1287_v6 = vpack.c.bf16 %v1281_v5, %v1281_v5  ;;  %v2708_v7 = vpop.f32.mrb[25].mxu0  ;;  %v2904_v5 = vld [vmem:[%s3801_s12 + $0x30] sm:$0xff]  }
 0x632   : > { %v1284_v8 = vpop.f32.mrb[26].mxu0 }
 0x633   : > { %v2709_v9 = vpop.f32.mrb[27].mxu0  ;;  %2715 = vmatmul.mubr.msk.bf16.vlgmr.msra.gmra.mrb[28].mxu0 %vm932_vm3, %v1287_v6 }
 0x634   : > { %2735 = vmatprep.mubr.msk.bf16.mxu0 %vm3131_vm0, %v3130_v1  ;;  %2732 = vmatpush3.bf16.msra.mxu0 %v2899_v10  ;;  %v2905_v10 = vld [vmem:[%s3801_s12 + $0x38] sm:$0xff]  }
 0x635   : > { %2733 = vmatprep.subr.bf16.mxu0 %v3130_v1 }
 0x638   : > { %2734 = vmatpush3.bf16.msra.mxu0 %v2901_v20 }
 0x639   : > { %2747 = vmatprep.subr.bf16.mxu0 %v3130_v1 }
 0x706   : > { %v1350_v12 = vpop.f32.mrb[28].mxu0 }
 0x707   : > { %v1351_v13 = vadd.f32 %v2530_v11, %v1350_v12  ;;  %v2716_v14 = vpop.f32.mrb[29].mxu0  ;;  %v2906_v12 = vld [vmem:[%s3803_s14] sm:$0xff]  }
 0x708   : > { %v1353_v17 = vpop.f32.mrb[30].mxu0 }
 0x709   : > { %v2717_v18 = vpop.f32.mrb[31].mxu0  ;;  %2719 = vmatpush3.msk.msra.mxu1 %vm1360_vm8, %v1351_v13  ;;  %v2907_v17 = vld [vmem:[%s3803_s14 + $0x8] sm:$0xff]  }
 0x70a   : > { %2721 = vmatmul.mubr.msk.f32.vlgmr.msra.gmra.mrb[0].mxu1 %vm1239_vm7, %v1356_v15  ;;  %2723 = vmatprep.subr.bf16.mxu1 %v3130_v1  ;;  %v2565_v18 = vld [vmem:[%s3802_s13 + $0x3] ss:$0 sm:$0xff] }
 0x70b   : > { %2724 = vmatpush3.bf16.msra.mxu1 %v2898_v16  ;;  %2727 = vmatprep.mubr.msk.bf16.mxu1 %vm3131_vm0, %v3130_v1 }
 0x70c   : > { %2725 = vmatprep.subr.bf16.mxu1 %v3130_v1 }
 0x70f   : > { %2726 = vmatpush3.bf16.msra.mxu1 %v2900_v19 }
 0x710   : > { %2739 = vmatprep.subr.bf16.mxu1 %v3130_v1 }
 0x7dd   : > { %v1430_v21 = vpop.f32.mrb[0].mxu1 }
 0x7de   : > { %v3593_v23 = vpack.c.bf16 %v1430_v21, %v1430_v21  ;;  %v2722_v24 = vpop.f32.mrb[1].mxu1 }
 0x7e0   : > { %2728 = vmatmul.mubr.msk.bf16.vlgmr.msra.gmra.mrb[4].mxu1 %vm932_vm3, %v3593_v23  ;;  %2736 = vmatmul.mubr.msk.bf16.vlgmr.msra.gmra.mrb[32].mxu0 %vm932_vm3, %v3593_v23 }
 0x7e1   : > { %2740 = vmatpush3.bf16.msra.mxu1 %v2902_v22  ;;  %2743 = vmatprep.mubr.msk.bf16.mxu1 %vm3131_vm0, %v3130_v1  ;;  %v2908_v22 = vld [vmem:[%s3803_s14 + $0x10] sm:$0xff]  }
 0x7e2   : > { %2741 = vmatprep.subr.bf16.mxu1 %v3130_v1  ;;  %2749 = vmatprep.mubr.msk.bf16.mxu0 %vm3131_vm0, %v3130_v1 }
 0x7e5   : > { %2742 = vmatpush3.bf16.msra.mxu1 %v2903_v25 }
 0x7e6   : > { %2753 = vmatprep.subr.bf16.mxu1 %v3130_v1 }
 0x7e8   : > { %2744 = vmatmul.mubr.msk.bf16.vlgmr.msra.gmra.mrb[8].mxu1 %vm932_vm3, %v3593_v23 }
 0x7e9   : > { %2755 = vmatprep.mubr.msk.bf16.mxu1 %vm3131_vm0, %v3130_v1 }
 0x8b3   : > { %v1497_v28 = vpop.f32.mrb[4].mxu1  ;;  %v1562_v29 = vpop.f32.mrb[32].mxu0 }
 0x8b4   : > { %v1563_v30 = vadd.f32 %v2545_v26, %v1562_v29  ;;  %v2729_v31 = vpop.f32.mrb[5].mxu1  ;;  %v2737_v32 = vpop.f32.mrb[33].mxu0  ;;  %v1498_v35 = vadd.f32 %v2536_v27, %v1497_v28  ;;  %v2571_v26 = vld [vmem:[%s3866_s24] ss:$0 sm:$0xff] }
 0x8b5   : > { %v1500_v33 = vpop.f32.mrb[6].mxu1  ;;  %v1565_v34 = vpop.f32.mrb[34].mxu0 }
 0x8b6   : > { %v1635_v36 = vpack.c.bf16 %v1563_v30, %v1563_v30  ;;  %v2730_v37 = vpop.f32.mrb[7].mxu1  ;;  %v2738_v38 = vpop.f32.mrb[35].mxu0  ;;  %v1633_v41 = vmul.f32 0.17677669, %v1498_v35  ;;  %v2102_v33 = vld [vmem:[%s740_s3] sm:$0x1] }
 0x8b7   : > { %v2103_v34 = vld [vmem:[%s3867_s23] sm:$0x1]  ;;  %s3872_s23 = sld [smem:[#allocation21_spill]] }
 0x8b8   : > { %v1640_v39 = vsel %vm932_vm3, %v1635_v36, 0  ;;  %v1634_v46 = vpack.c.bf16 %v1633_v41, %v1633_v41  ;;  %v2104_v35 = vmul.f32 %v2103_v34, %v2102_v33  ;;  %v2117_v37 = vld [vmem:[%s3868_s16] sm:$0x1]  ;;  %s2308_s16 = sshll.u32 %s827_s0, 4  ;;  %s3747_s16 = int_to_ptr.vmem [resolvable:$true] %s2308_s16 }
 0x8b9   : > { %2748 = vmatpush3.bf16.xpose.msra.mxu0 %v1640_v39  ;;  %v2145_v33 = vld [vmem:[#allocation2] sm:$0x1]  ;;  %s3050_s22 = scalar_lea.vmem %s3747_s16, 16 }
 0x8ba   : > { %2759 = vmatprep.subr.bf16.mxu0 %v3130_v1  ;;  %v2106_v36 = vsel %vm2105_vm15, %v2104_v35, 0.0  ;;  %p3051_p3 = scmp.ne.s32.totalorder %s3747_s16, %s3050_s22 }
 0x8bb   : > { %v1627_v42 = vpop.f32.mrb[8].mxu1  ;;  %2107 = vadd.xlane.f32.xlu0 %v2106_v36 }
 0x8bc   : > { %v1628_v43 = vadd.f32 %v2554_v40, %v1627_v42  ;;  %v2745_v44 = vpop.f32.mrb[9].mxu1  ;;  %v2580_v42 = vld [vmem:[%s3866_s24 + $0x1] ss:$0 sm:$0xff] }
 0x8bd   : > { %v1630_v45 = vpop.f32.mrb[10].mxu1  ;;  %p3875_p6 = scmp.ne.s32.totalorder %s3872_s23, 0 }
 0x8be   : > { %v1702_v47 = vpack.c.bf16 %v1628_v43, %v1628_v43  ;;  %v2746_v48 = vpop.f32.mrb[11].mxu1 }
 0x8bf   : > { %p3052_p11 = pnand %p3051_p3, %p3875_p6 }
 0x8c0   : > { %v1709_v49 = vsel %vm1707_vm9, %v1702_v47, 0  ;;  %2750 = vmatmul.mubr.msk.bf16.vlgmr.msra.gmra.mrb[36].mxu0 %vm932_vm3, %v1634_v46 }
 0x8c1   : > { %2754 = vmatpush3.bf16.msra.mxu1 %v1709_v49  ;;  %2763 = vmatprep.mubr.msk.bf16.mxu0 %vm3131_vm0, %v3130_v1  ;;  %p3053_p8 = pneg %p3052_p11 }
 0x8c2   : > { %2767 = vmatprep.subr.mxu1 %v3130_v1  ;;  %2760 = vmatpush3.bf16.msra.mxu0 %v2904_v5 }
 0x8c3   : > { %2761 = vmatprep.subr.bf16.mxu0 %v3130_v1 }
 0x8c6   : > { %2762 = vmatpush3.bf16.msra.mxu0 %v2905_v10 }
 0x8c7   : > { %2772 = vmatprep.subr.bf16.mxu0 %v3130_v1 }
 0x948   : > { %v2108_v48 = vpop.xlane.xlu0 %2107 }
 0x949   : > { %v2109_v49 = vrot.slane %v2108_v48, 4 }
 0x94b   : > { %v2110_v50 = vadd.f32 %v2109_v49, %v2108_v48 }
 0x94d   : > { %v2111_v51 = vrot.slane %v2110_v50, 2 }
 0x94f   : > { %v2112_v55 = vadd.f32 %v2111_v51, %v2110_v50 }
 0x951   : > { %v2113_v56 = vrot.slane %v2112_v55, 1 }
 0x993   : > { %v1676_v57 = vpop.f32.mrb[36].mxu0 }
 0x994   : > { %v1688_v58 = vsel %vm1687_vm11, %v1676_v57, -1e+30  ;;  %v2751_v59 = vpop.f32.mrb[37].mxu0  ;;  %v2114_v57 = vadd.f32 %v2113_v56, %v2112_v55 }
 0x995   : > { %v1679_v60 = vpop.f32.mrb[38].mxu0  ;;  %v1690_v61 = vsel %vm1689_vm12, %v1688_v58, -inf }
 0x996   : > { %1691 = vmax.xlane.f32.xlu1 %v1690_v61  ;;  %v2752_v62 = vpop.f32.mrb[39].mxu0  ;;  %2814 = vpush %v2114_v57  ;;  %v2911_v60 = vld [vmem:[%s3488_s29 + $0x8] sm:$0xff]   ;;  %v2912_v61 = vld [vmem:[%s3488_s29 + $0x10] sm:$0xff]  }
 0x997   : > { %v2223_v62 = vsel %vm932_vm3, %v2912_v61, 0 }
 0xa23   : > { %v1692_v63 = vpop.xlane.xlu1 %1691 }
 0xa24   : > { %v1693_v0 = vsub.f32 %v1688_v58, %v1692_v63  ;;  %v2910_v58 = vld [vmem:[%s3488_s29] sm:$0xff]   ;;  %v2913_v63 = vld [vmem:[%s3488_s29 + $0x18] sm:$0xff]  }
 0xa25   : > { %v2217_v59 = vsel %vm932_vm3, %v2910_v58, 0 }
 0xa26   : > { %v1694_v2 = vmul.f32 1.442695, %v1693_v0  ;;  %v2226_v0 = vsel %vm932_vm3, %v2913_v63, 0 }
 0xa28   : > { %2922 = vpow2.f32 %v1694_v2  ;;  %v2914_v2 = vld [vmem:[%s3488_s29 + $0x20] sm:$0xff]  }
 0xa32   : > { %v2923_v3 = vpop.eup %2922 }
 0xa33   : > { %v1696_v4 = vsel %vm1689_vm12, %v2923_v3, 0.0 }
 0xa34   : > { %1697 = vadd.xlane.f32.xlu1 %v1696_v4  ;;  %v2915_v4 = vld [vmem:[%s3488_s29 + $0x28] sm:$0xff]  }
 0xa35   : > { %v2232_v5 = vsel %vm932_vm3, %v2915_v4, 0 }
 0xac1   : > { %v1698_v6 = vpop.xlane.xlu1 %1697 }
 0xac2   : > { %2924 = vrcp.f32 %v1698_v6  ;;  %v2916_v6 = vld [vmem:[%s3488_s29 + $0x30] sm:$0xff]  }
 0xac3   : > { %v2235_v10 = vsel %vm932_vm3, %v2916_v6, 0 }
 0xacc   : > { %v2925_v7 = vpop.eup %2924 }
 0xacd   : > { %v1700_v8 = vmul.f32 %v2925_v7, %v2923_v3  ;;  %v2229_v3 = vsel %vm932_vm3, %v2914_v2, 0 }
 0xacf   : > { %v1701_v9 = vpack.c.bf16 %v1700_v8, %v1700_v8 }
 0xad1   : > { %2756 = vmatmul.mubr.msk.bf16.vlgmr.msra.gmra.mrb[12].mxu1 %vm1703_vm13, %v1701_v9 }
 0xad2   : > { %2769 = vmatprep.mubr.msk.f32.mxu1 %vm3131_vm0, %v3130_v1 }
 0xba4   : > { %v1745_v11 = vpop.f32.mrb[12].mxu1 }
 0xba5   : > { %v1751_v13 = vpack.c.bf16 %v1745_v11, %v1745_v11  ;;  %v2757_v14 = vpop.f32.mrb[13].mxu1 }
 0xba6   : > { %v1748_v15 = vpop.f32.mrb[14].mxu1 }
 0xba7   : > { %v2758_v16 = vpop.f32.mrb[15].mxu1  ;;  %2764 = vmatmul.mubr.msk.bf16.vlgmr.msra.gmra.mrb[40].mxu0 %vm932_vm3, %v1751_v13  ;;  %v2917_v13 = vld [vmem:[%s3488_s29 + $0x38] sm:$0xff]   ;;  %s2815_s29 = spop %2814 }
 0xba8   : > { %2773 = vmatpush3.bf16.msra.mxu0 %v2906_v12  ;;  %2776 = vmatprep.mubr.msk.bf16.mxu0 %vm3131_vm0, %v3130_v1  ;;  %v2238_v16 = vsel %vm932_vm3, %v2917_v13, 0 }
 0xba9   : > { %2774 = vmatprep.subr.bf16.mxu0 %v3130_v1 }
 0xbac   : > { %2775 = vmatpush3.bf16.msra.mxu0 %v2907_v17  ;;  %v2147_v17 = vld [vmem:[%s3869_s5] sm:$0x1]  ;;  %s3745_s5 = scalar_lea.hbm %s3873_s28, %s2595_s1 }
 0xbad   : > { %2788 = vmatprep.subr.mxu0 %v3130_v1 }
 0xbaf   : > { %2777 = vmatmul.mubr.msk.bf16.vlgmr.msra.gmra.mrb[44].mxu0 %vm932_vm3, %v3593_v23  ;;  %v2909_v23 = vld [vmem:[%s3803_s14 + $0x18] sm:$0xff]  }
 0xbb0   : > { %2790 = vmatprep.mubr.msk.f32.mxu0 %vm3131_vm0, %v3130_v1 }
 0xc7a   : > { %v1814_v19 = vpop.f32.mrb[40].mxu0 }
 0xc7b   : > { %v1815_v20 = vadd.f32 %v2565_v18, %v1814_v19  ;;  %v2765_v21 = vpop.f32.mrb[41].mxu0  ;;  %v2131_v18 = vld [vmem:[%s3870_s4] sm:$0x1]  ;;  %s3054_s4 = sshll.u32 %s3133_s20, 4  ;;  %s3055_s4 = int_to_ptr.vmem [resolvable:$false] %s3054_s4 }
 0xc7c   : > { %v1817_v24 = vpop.f32.mrb[42].mxu0  ;;  %p3057_p13 = scmp.lt.s32.totalorder %s3747_s16, %s3055_s4 }
 0xc7d   : > { %v2766_v25 = vpop.f32.mrb[43].mxu0  ;;  %2768 = vmatpush3.msk.msra.mxu1 %vm1823_vm14, %v1815_v20 }
 0xc7e   : > { %2770 = vmatmul.mubr.msk.f32.vlgmr.msra.gmra.mrb[2].mxu1 %vm1703_vm13, %v3630_v52  ;;  %2780 = vmatprep.subr.bf16.mxu1 %v3130_v1 }
 0xc7f   : > { %2781 = vmatpush3.bf16.msra.mxu1 %v2908_v22  ;;  %2784 = vmatprep.mubr.msk.bf16.mxu1 %vm3131_vm0, %v3130_v1 }
 0xc80   : > { %2782 = vmatprep.subr.bf16.mxu1 %v3130_v1 }
 0xc82   : > { %v1954_v27 = vpop.f32.mrb[44].mxu0 }
 0xc83   : > { %v1955_v28 = vadd.f32 %v2571_v26, %v1954_v27  ;;  %v2778_v29 = vpop.f32.mrb[45].mxu0  ;;  %2783 = vmatpush3.bf16.msra.mxu1 %v2909_v23 }
 0xc84   : > { %v1957_v30 = vpop.f32.mrb[46].mxu0  ;;  %2793 = vmatprep.subr.bf16.mxu1 %v3130_v1  ;;  %v2116_v29 = vstv %s2815_s29  ;;  %s3056_s29 = scalar_lea.vmem %s3055_s4, 32 }
 0xc85   : > { %v1960_v31 = vpack.c.bf16 %v1955_v28, %v1955_v28  ;;  %v2779_v32 = vpop.f32.mrb[47].mxu0  ;;  %p3058_p7 = scmp.lt.s32.totalorder %s3056_s29, %s3050_s22 }
 0xc87   : > { %2785 = vmatmul.mubr.msk.bf16.vlgmr.msra.gmra.mrb[16].mxu1 %vm932_vm3, %v1960_v31  ;;  %p3059_p0 = por %p3058_p7, %p3057_p13 }
 0xc88   : > { %2809 = vmatprep.mubr.msk.bf16.mxu1 %vm3131_vm0, %v3130_v1 }
 0xc89   : > { %p3060_p10 = pnand %p3059_p0, %p3053_p8 }
 0xc8c   : > { %2794 = vmatpush3.bf16.xpose.msra.mxu1 %v2217_v59 }
 0xc8d   : > { %2795 = vmatprep.subr.bf16.mxu1 %v3130_v1 }
 0xd51   : > { %v1893_v38 = vpop.f32.mrb[2].mxu1 }
 0xd52   : > { %v2118_v39 = vmul.f32 %v2117_v37, %v1893_v38  ;;  %v2771_v40 = vpop.f32.mrb[3].mxu1 }
 0xd53   : > { %v2280_v40 = vld [vmem:[%s3871_s25] sm:$0x1] }
 0xd54   : > { %v2119_v41 = vsel %vm2105_vm15, %v2118_v39, 0.0  ;;  %vm2281_vm0 = vcmp.gt.f32.partialorder %v2280_v40, 0.0 }
 0xd55   : > { %2120 = vadd.xlane.f32.xlu1 %v2119_v41 }
 0xd5a   : > { %v2023_v43 = vpop.f32.mrb[16].mxu1 }
 0xd5b   : > { %v2024_v44 = vadd.f32 %v2580_v42, %v2023_v43  ;;  %v2786_v45 = vpop.f32.mrb[17].mxu1 }
 0xd5c   : > { %v2026_v46 = vpop.f32.mrb[18].mxu1 }
 0xd5d   : > { %v2787_v47 = vpop.f32.mrb[19].mxu1  ;;  %2789 = vmatpush3.msk.msra.mxu0 %vm1823_vm14, %v2024_v44 }
 0xd5e   : > { %2791 = vmatmul.mubr.msk.f32.vlgmr.msra.gmra.mrb[48].mxu0 %vm1703_vm13, %v3630_v52  ;;  %v2220_v52 = vsel %vm932_vm3, %v2911_v60, 0 }
 0xd5f   : > { %2796 = vmatpush3.bf16.xpose.msra.mxu1 %v2220_v52 }
 0xd60   : > { %2797 = vmatprep.subr.bf16.mxu1 %v3130_v1 }
 0xd67   : > { %2798 = vmatpush3.bf16.xpose.msra.mxu1 %v2223_v62 }
 0xd68   : > { %2799 = vmatprep.subr.bf16.mxu1 %v3130_v1 }
 0xd6f   : > { %2800 = vmatpush3.bf16.xpose.msra.mxu1 %v2226_v0 }
 0xd70   : > { %2801 = vmatprep.subr.bf16.mxu1 %v3130_v1 }
 0xd77   : > { %2802 = vmatpush3.bf16.xpose.msra.mxu1 %v2229_v3 }
 0xd78   : > { %2803 = vmatprep.subr.bf16.mxu1 %v3130_v1 }
 0xd7f   : > { %2804 = vmatpush3.bf16.xpose.msra.mxu1 %v2232_v5 }
 0xd80   : > { %2805 = vmatprep.subr.bf16.mxu1 %v3130_v1 }
 0xd87   : > { %2806 = vmatpush3.bf16.xpose.msra.mxu1 %v2235_v10 }
 0xd88   : > { %2807 = vmatprep.subr.bf16.mxu1 %v3130_v1 }
 0xd8f   : > { %2808 = vmatpush3.bf16.xpose.msra.mxu1 %v2238_v16 }
 0xd96   : > { %2810 = vmatmul.mubr.msk.bf16.vlgmr.msra.gmra.mrb[20].mxu1 %vm932_vm3, %v2147_v17 }
 0xde2   : > { %v2121_v7 = vpop.xlane.xlu1 %2120 }
 0xde3   : > { %v2122_v8 = vrot.slane %v2121_v7, 4 }
 0xde5   : > { %v2123_v9 = vadd.f32 %v2122_v8, %v2121_v7 }
 0xde7   : > { %v2124_v11 = vrot.slane %v2123_v9, 2 }
 0xde9   : > { %v2125_v12 = vadd.f32 %v2124_v11, %v2123_v9 }
 0xdeb   : > { %v2126_v14 = vrot.slane %v2125_v12, 1 }
 0xded   : > { %v2127_v15 = vadd.f32 %v2126_v14, %v2125_v12 }
 0xdef   : > { %2816 = vpush %v2127_v15 }
 0xe20   : > { %s2817_s17 = spop %2816 }
 0xe21   : > { %v2129_v30 = vstv %s2817_s17 }
 0xe22   : > { %v2130_v31 = vadd.f32 %v2129_v30, %v2116_v29 }
 0xe31   : > { %v2098_v19 = vpop.f32.mrb[48].mxu0 }
 0xe32   : > { %v2132_v20 = vmul.f32 %v2131_v18, %v2098_v19  ;;  %v2792_v1 = vpop.f32.mrb[49].mxu0 }
 0xe34   : > { %v2133_v21 = vsel %vm2105_vm15, %v2132_v20, 0.0 }
 0xe35   : > { %2134 = vadd.xlane.f32.xlu0 %v2133_v21 }
 0xe69   : > { %v2274_v36 = vpop.f32.mrb[20].mxu1 }
 0xe6a   : > { %v2811_v37 = vpop.f32.mrb[21].mxu1 }
 0xe6b   : > { %v2277_v38 = vpop.f32.mrb[22].mxu1 }
 0xe6c   : > { %v2812_v39 = vpop.f32.mrb[23].mxu1 }
 0xec2   : > { %v2135_v22 = vpop.xlane.xlu0 %2134 }
 0xec3   : > { %v2136_v24 = vrot.slane %v2135_v22, 4 }
 0xec5   : > { %v2137_v25 = vadd.f32 %v2136_v24, %v2135_v22 }
 0xec7   : > { %v2138_v23 = vrot.slane %v2137_v25, 2 }
 0xec9   : > { %v2139_v26 = vadd.f32 %v2138_v23, %v2137_v25 }
 0xecb   : > { %v2140_v27 = vrot.slane %v2139_v26, 1 }
 0xecd   : > { %v2141_v28 = vadd.f32 %v2140_v27, %v2139_v26 }
 0xecf   : > { %2818 = vpush %v2141_v28 }
 0xf00   : > { %s2819_s19 = spop %2818 }
 0xf01   : > { %v2143_v32 = vstv %s2819_s19 }
 0xf02   : > { %v2144_v34 = vadd.f32 %v2143_v32, %v2130_v31 }
 0xf04   : > { %v2146_v35 = vadd.f32 %v2145_v33, %v2144_v34 }
 0xf06   : > { %2166 = vperm.xlu1 %2884, %v2146_v35  }
 0xf85   : > { %v2167_v41 = vpop.permute.xlu1 %2166 }
 0xf86   : > { %v2172_v42 = vrot.slane %v2167_v41, %v1685_v54 }
 0xf88   : > { %v2275_v43 = vadd.f32 %v2274_v36, %v2172_v42 }
 0xf8a   : > { %v2282_v44 = vsel %vm2281_vm0, %v2275_v43, -1e+30 }
 0xf8b   : > { %v2283_v45 = vsel %vm1707_vm9, %v2282_v44, -inf }
 0xf8c   : > { %2284 = vmax.xlane.f32.xlu0 %v2283_v45 }
0x1019   : > { %v2285_v46 = vpop.xlane.xlu0 %2284 }
0x101a   : > { %v2286_v47 = vsub.f32 %v2282_v44, %v2285_v46 }
0x101c   : > { %v2287_v48 = vmul.f32 1.442695, %v2286_v47 }
0x101e   : > { %2926 = vpow2.f32 %v2287_v48 }
0x1028   : > { %v2927_v49 = vpop.eup %2926 }
0x1029   : > { %v2289_v50 = vsel %vm1707_vm9, %v2927_v49, 0.0 }
0x102a   : > { %2290 = vadd.xlane.f32.xlu0 %v2289_v50 }
0x10b7   : > { %v2291_v53 = vpop.xlane.xlu0 %2290 }
0x10b8   : > { %2928 = vrcp.f32 %v2291_v53 }
0x10c2   : > { %v2929_v54 = vpop.eup %2928 }
0x10c3   : > { %v2293_v51 = vmul.f32 %v2929_v54, %v2927_v49 }
0x10c5   : > { %2294 = vst [vmem:[%s827_s0] sm:$0x1] %v2293_v51 }
0x10c6   : > { %3063 = shalt.err (!%p3060_p10)
}
0x10c7   : > { %s3064_s18 = scalar_lea.hbm %s3745_s5, 16  ;;  %s3068_s25 = scalar_lea.hbm %s3874_s2, 32 }
0x10c8   : > { %p3065_p12 = scmp.ne.s32.totalorder %s3745_s5, %s3064_s18  ;;  %p3069_p4 = scmp.lt.u32.totalorder %s3745_s5, %s3874_s2 }
0x10c9   : > { %p3070_p1 = scmp.lt.u32.totalorder %s3068_s25, %s3064_s18  ;;  %p3072_p3 = scmp.lt.u32.totalorder %s3064_s18, %s3745_s5 }
0x10ca   : > { %p3066_p5 = pnand %p3065_p12, %p3875_p6 }
0x10cb   : > { %p3071_p2 = por %p3070_p1, %p3069_p4 }
0x10cc   : > { %p3067_p9 = pneg %p3066_p5 }
0x10cd   : > { %p3073_p11 = por %p3072_p3, %p3071_p2 }
0x10cf   : > { %p3074_p8 = pnand %p3073_p11, %p3067_p9 }
0x10d1   : > { %3077 = shalt.err (!%p3074_p8)
}
0x10d2   : > { %2828 = dma.vmem_to_hbm [thread:$0]  (%p3875_p6), %s3747_s16, 16, %s3745_s5, %s2296_s15  }
0x10d3 PF: > { %s3876_s3 = sld [smem:[#allocation16_spill]]  ;;  %s3877_s26 = sld [smem:[#allocation22_spill]] }
0x10d4   : > { %s3878_s28 = sld [smem:[#allocation18_spill]] }
0x10d9   : > { %s2320_s22 = sand.u32 1, %s3876_s3   ;;  %p3879_p13 = scmp.ne.s32.totalorder %s3877_s26, 0 }
0x10da   : > { %p3880_p7 = scmp.ge.s32.totalorder %s3878_s28, 2  ;;  %s2321_s20 = scalar_lea.sflag [#allocation5], %s2320_s22 }
0x10dc   : > { %p2844_p0 = pnand %p3880_p7, %p3879_p13 }
0x10de   : > { %3107 = dma.done.wait (!%p2844_p0), %s2321_s20, 16  }
0x10df   : > { %3109 = vsyncadd (!%p2844_p0), %s2321_s20, 4294967280  ;;  %s3881_s28 = sld [smem:[#allocation19_spill]]  ;;  %s3882_s4 = sld [smem:[#allocation17_spill]] }
0x10e0   : > { %s3883_s3 = sld [smem:[#allocation20_spill]]  ;;  %s3884_s26 = smov %s3116_s27 }
0x10e5   : > { %p42_p10 = scmp.ge.s32.totalorder %s3881_s28, 4   ;;  %s3885_s27 = smov %s3882_s4 }
0x10e7   :  { %44 = sbr.rel (!%p42_p10) target bundleno = 22 (0x16), region = 212 }
0x10ee   :  { %2325 = vsyncpa [#allocation4], 1 }
0x10ef   :  { %2327 = vsyncpa [#allocation4 + $0x1], 1 }
0x10f0   :  { %2328 = vsyncpa [#allocation7], 1 }
0x10f1   :  { %2330 = vsyncpa [#allocation7 + $0x1], 1 }
0x10f2   :  { %2331 = vsyncpa [#allocation10], 1 }
0x10f3   :  { %2333 = vsyncpa [#allocation10 + $0x1], 1 }
0x10f4   :  { %2334 = vsyncpa [#allocation5], 1 }
0x10f5   :  { %2336 = vsyncpa [#allocation5 + $0x1], 1 }

</bundles_post_ra>
